<compile_context>
chip_gen: v7x
topology: tpu7x:2x2x1
jax: 0.10.0
libtpu: 0.0.40
codegen_flags: <defaults>
</compile_context>

<pallas_src>
import jax
import jax.numpy as jnp
import numpy as np
from jax.experimental import pallas as pl
from jax.experimental.pallas import tpu as pltpu

# Small, forward-consistent shapes (original module: hidden=128, input=3, layers=2)
INPUT_SIZE = 3
HIDDEN = 32
NUM_LAYERS = 2
OUTPUT_SIZE = 3
BATCH = 2
SEQ = 8
DIN_PAD = 8          # input feature dim padded (3 -> 8) for aligned matmuls

# Row offsets of the blocks inside the fused weight slab (all multiples of 8).
R_W0IH = 0                       # (2*DIN_PAD, 8H) block-diag, gate-interleaved
R_W0HH = R_W0IH + 2 * DIN_PAD    # 16:  (2H, 8H)   block-diag, gate-interleaved
R_W1IH = R_W0HH + 2 * HIDDEN     # 80:  (2H, 8H)   [W1f_ih^T | W1b_ih^T]
R_W1HH = R_W1IH + 2 * HIDDEN     # 144: (H, 8H)    W1f_hh^T (cols 4H:8H zero-padded)
R_FCW = R_W1HH + HIDDEN          # 176: (2H, 8H)   fc_w^T   (cols O:8H zero-padded)
R_END = R_FCW + 2 * HIDDEN       # 240


# ---------------------------------------------------------------------------
# Pallas kernel (whole model, grid-less, fully VMEM-resident)
# ---------------------------------------------------------------------------
def _lstm_cell(gates, c):
    """Single-direction LSTM cell, PyTorch gate order i, f, g, o.  gates: (B, 4H)."""
    H = HIDDEN
    i_g = jax.nn.sigmoid(gates[:, 0 * H:1 * H])
    f_g = jax.nn.sigmoid(gates[:, 1 * H:2 * H])
    g_g = jnp.tanh(gates[:, 2 * H:3 * H])
    o_g = jax.nn.sigmoid(gates[:, 3 * H:4 * H])
    c_new = f_g * c + i_g * g_g
    h_new = o_g * jnp.tanh(c_new)
    return h_new, c_new


def _fused_lstm_kernel(x_ref, w_ref, b_ref, out_ref, buf):
    """x_ref: (S*B, 2*DIN_PAD), rows (t, b) hold [x(t) | x(S-1-t)] (features zero-padded).
    w_ref: (240, 8H) fused weight slab (see R_* offsets).  b_ref: (3, 8H).
    buf:   (S*B, 2H) VMEM scratch holding layer-0 outputs [h0_fwd(t) | h0_bwd(t)]."""
    S, B, H = SEQ, BATCH, HIDDEN

    # ---------------- layer 0 ----------------
    # Input projection for all timesteps and both directions in one matmul, bias folded.
    # Output column order: [i_f i_b f_f f_b g_f g_b o_f o_b] (each block H wide).
    xproj0 = jnp.dot(x_ref[...], w_ref[R_W0IH:R_W0HH, :],
                     preferred_element_type=jnp.float32) + b_ref[0:1, :]

    h0 = jnp.zeros((B, 2 * H), jnp.float32)       # [h_fwd | h_bwd]
    c0 = jnp.zeros((B, 2 * H), jnp.float32)
    for t in range(S):
        gates = jnp.dot(h0, w_ref[R_W0HH:R_W1IH, :],
                        preferred_element_type=jnp.float32) + xproj0[t * B:(t + 1) * B, :]
        i_g = jax.nn.sigmoid(gates[:, 0:2 * H])
        f_g = jax.nn.sigmoid(gates[:, 2 * H:4 * H])
        g_g = jnp.tanh(gates[:, 4 * H:6 * H])
        o_g = jax.nn.sigmoid(gates[:, 6 * H:8 * H])
        c0 = f_g * c0 + i_g * g_g
        h0 = o_g * jnp.tanh(c0)                   # [h_fwd(t) | h_bwd(S-1-t)]
        # write back at the original time indices (PyTorch bidirectional semantics)
        buf[t * B:(t + 1) * B, 0:H] = h0[:, 0:H]
        buf[(S - 1 - t) * B:(S - t) * B, H:2 * H] = h0[:, H:2 * H]

    # ---------------- layer 1 ----------------
    # Input projection for all steps: cols 0:4H = fwd direction, 4H:8H = bwd direction.
    xproj1 = jnp.dot(buf[...], w_ref[R_W1IH:R_W1HH, :],
                     preferred_element_type=jnp.float32) + b_ref[1:2, :]

    h1 = jnp.zeros((B, H), jnp.float32)
    c1 = jnp.zeros((B, H), jnp.float32)
    for t in range(S):
        g1 = jnp.dot(h1, w_ref[R_W1HH:R_FCW, 0:4 * H],
                     preferred_element_type=jnp.float32) + xproj1[t * B:(t + 1) * B, 0:4 * H]
        h1, c1 = _lstm_cell(g1, c1)

    # Layer-1 backward direction: only its value at time S-1 feeds out[:, -1, :]; that
    # is its first step from a zero state, so its gates are just the input projection.
    g1b = xproj1[(S - 1) * B:S * B, 4 * H:8 * H]
    h1b, _ = _lstm_cell(g1b, jnp.zeros((B, H), jnp.float32))

    # ---------------- FC head on out[:, -1, :] = [h1_fwd(S-1) | h1_bwd(S-1)] ----------
    feat = jnp.concatenate([h1, h1b], axis=-1)                        # (B, 2H)
    res = jnp.dot(feat, w_ref[R_FCW:R_END, :],
                  preferred_element_type=jnp.float32) + b_ref[2:3, :]
    out_ref[...] = res[:, 0:out_ref.shape[1]].astype(out_ref.dtype)


# ---------------------------------------------------------------------------
# Host-side weight packing
# ---------------------------------------------------------------------------
def _dir_params(p, din_pad):
    """Return (W_ih^T padded to din_pad rows, W_hh^T, combined bias) for one direction."""
    wih_t = jnp.asarray(p["w_ih"], jnp.float32).T                  # (din, 4H)
    din = wih_t.shape[0]
    wih_t = jnp.pad(wih_t, ((0, din_pad - din), (0, 0)))
    whh_t = jnp.asarray(p["w_hh"], jnp.float32).T                  # (H, 4H)
    b = (p["b_ih"] + p["b_hh"]).astype(jnp.float32)                # (4H,)
    return wih_t, whh_t, b


def _interleave_bidir_w(wf, wb):
    """Block-diagonal weight with gate-interleaved columns.
    wf, wb: (K, 4H).  Returns (2K, 8H): rows 0:K act on the fwd input slot, rows K:2K
    on the bwd slot; columns ordered [i_f i_b f_f f_b g_f g_b o_f o_b]."""
    H = HIDDEN
    K = wf.shape[0]
    w = jnp.zeros((2 * K, 8 * H), jnp.float32)
    for k in range(4):
        w = w.at[:K, (2 * k) * H:(2 * k + 1) * H].set(wf[:, k * H:(k + 1) * H])
        w = w.at[K:, (2 * k + 1) * H:(2 * k + 2) * H].set(wb[:, k * H:(k + 1) * H])
    return w


def _interleave_bidir_b(bf, bb):
    H = HIDDEN
    b = jnp.zeros((8 * H,), jnp.float32)
    for k in range(4):
        b = b.at[(2 * k) * H:(2 * k + 1) * H].set(bf[k * H:(k + 1) * H])
        b = b.at[(2 * k + 1) * H:(2 * k + 2) * H].set(bb[k * H:(k + 1) * H])
    return b


# ---------------------------------------------------------------------------
# Wrapper
# ---------------------------------------------------------------------------
def lstm_model_forward(x, params):
    """Full forward: bidirectional 2-layer LSTM -> last timestep -> Linear."""
    B, S, Din = x.shape
    H = HIDDEN
    assert Din <= DIN_PAD, "DIN_PAD must cover the input feature dim"

    # inputs: time-major, zero-padded features; bwd copy pre-reversed in time so the
    # in-kernel layer-0 input projection covers both directions with one matmul.
    x_tm = jnp.transpose(x, (1, 0, 2)).astype(jnp.float32)            # (S, B, Din)
    x_pad = jnp.pad(x_tm, ((0, 0), (0, 0), (0, DIN_PAD - Din)))       # (S, B, DIN_PAD)
    x_both = jnp.concatenate([x_pad, x_pad[::-1]], axis=-1)           # (S, B, 2*DIN_PAD)
    x_flat = x_both.reshape(S * B, 2 * DIN_PAD)

    # fused weight / bias slabs (3 operands total)
    w0f_ih, w0f_hh, b0f = _dir_params(params["l0_fwd"], DIN_PAD)
    w0b_ih, w0b_hh, b0b = _dir_params(params["l0_bwd"], DIN_PAD)
    w1f_ih, w1f_hh, b1f = _dir_params(params["l1_fwd"], 2 * H)
    w1b_ih, _, b1b = _dir_params(params["l1_bwd"], 2 * H)

    w0_ih = _interleave_bidir_w(w0f_ih, w0b_ih)                       # (2*DIN_PAD, 8H)
    w0_hh = _interleave_bidir_w(w0f_hh, w0b_hh)                       # (2H, 8H)
    w1_ih = jnp.concatenate([w1f_ih, w1b_ih], axis=1)                 # (2H, 8H)
    w1_hh = jnp.pad(w1f_hh, ((0, 0), (0, 4 * H)))                     # (H, 8H)
    fc_w = jnp.asarray(params["fc_w"], jnp.float32).T                 # (2H, O)
    O = fc_w.shape[1]
    fc_w_pad = jnp.pad(fc_w, ((0, 0), (0, 8 * H - O)))                # (2H, 8H)
    w_slab = jnp.concatenate([w0_ih, w0_hh, w1_ih, w1_hh, fc_w_pad], axis=0)  # (240, 8H)

    b0 = _interleave_bidir_b(b0f, b0b)                                # (8H,)
    b1 = jnp.concatenate([b1f, b1b])                                  # (8H,)
    fc_b = jnp.pad(params["fc_b"].astype(jnp.float32), (0, 8 * H - O))
    b_slab = jnp.stack([b0, b1, fc_b], axis=0)                        # (3, 8H)

    # TODO(synk): for multi-sequence serving, add a leading "parallel" grid axis over
    # independent sequences so v7x's second TensorCore is used; a single tiny instance
    # is serial-latency bound and stays grid-less.
    return pl.pallas_call(
        _fused_lstm_kernel,
        out_shape=jax.ShapeDtypeStruct((B, O), jnp.float32),
        scratch_shapes=[pltpu.VMEM((S * B, 2 * H), jnp.float32)],     # layer-0 outputs
    )(x_flat, w_slab, b_slab)


# ---------------------------------------------------------------------------
# Pure-JAX reference (for correctness check)
# ---------------------------------------------------------------------------
def _ref_direction(x_tm, p, reverse):
    S, B, _ = x_tm.shape

    def step(carry, x_t):
        h, c = carry
        gates = x_t @ p["w_ih"].T + p["b_ih"] + h @ p["w_hh"].T + p["b_hh"]
        i, f, g, o = jnp.split(gates, 4, axis=-1)
        i, f, o = jax.nn.sigmoid(i), jax.nn.sigmoid(f), jax.nn.sigmoid(o)
        g = jnp.tanh(g)
        c = f * c + i * g
        h = o * jnp.tanh(c)
        return (h, c), h

    h0 = jnp.zeros((B, HIDDEN), jnp.float32)
    xs = x_tm[::-1] if reverse else x_tm
    _, hs = jax.lax.scan(step, (h0, h0), xs)
    return hs[::-1] if reverse else hs


def lstm_model_ref(x, params):
    x_tm = jnp.transpose(x, (1, 0, 2)).astype(jnp.float32)
    layer_in = x_tm
    for layer in range(NUM_LAYERS):
        outs = [_ref_direction(layer_in, params[f"l{layer}_fwd"], False),
                _ref_direction(layer_in, params[f"l{layer}_bwd"], True)]
        layer_in = jnp.concatenate(outs, axis=-1)
    last = layer_in[-1]
    return last @ params["fc_w"].T + params["fc_b"]


# ---------------------------------------------------------------------------
# Deterministic parameter init (PyTorch-style uniform(-1/sqrt(H), 1/sqrt(H)))
# ---------------------------------------------------------------------------
def init_params(key):
    params = {}
    k = 1.0 / np.sqrt(HIDDEN)
    for layer in range(NUM_LAYERS):
        din = INPUT_SIZE if layer == 0 else 2 * HIDDEN
        for name in ("fwd", "bwd"):
            key, k1, k2, k3, k4 = jax.random.split(key, 5)
            params[f"l{layer}_{name}"] = dict(
                w_ih=jax.random.uniform(k1, (4 * HIDDEN, din), jnp.float32, -k, k),
                w_hh=jax.random.uniform(k2, (4 * HIDDEN, HIDDEN), jnp.float32, -k, k),
                b_ih=jax.random.uniform(k3, (4 * HIDDEN,), jnp.float32, -k, k),
                b_hh=jax.random.uniform(k4, (4 * HIDDEN,), jnp.float32, -k, k),
            )
    key, k1, k2 = jax.random.split(key, 3)
    kf = 1.0 / np.sqrt(2 * HIDDEN)
    params["fc_w"] = jax.random.uniform(k1, (OUTPUT_SIZE, 2 * HIDDEN),
                                        jnp.float32, -kf, kf)
    params["fc_b"] = jax.random.uniform(k2, (OUTPUT_SIZE,), jnp.float32, -kf, kf)
    return params


if __name__ == "__main__":
    root = jax.random.PRNGKey(0)
    kp, kx = jax.random.split(root)
    params = init_params(kp)
    x = jax.random.normal(kx, (BATCH, SEQ, INPUT_SIZE), jnp.float32)

    out = jax.block_until_ready(lstm_model_forward(x, params))
    assert out.shape == (BATCH, OUTPUT_SIZE), out.shape

    ref = jax.block_until_ready(lstm_model_ref(x, params))
    np.testing.assert_allclose(np.asarray(out), np.asarray(ref),
                               rtol=1e-3, atol=1e-3)
    print("KERNEL_OK")
</pallas_src>

<mosaic_0001>
module attributes {stable_mosaic.version = 11 : i64} {
  func.func @_fused_lstm_kernel(%arg0: memref<16x16xf32, #tpu.memory_space<vmem>>, %arg1: memref<240x256xf32, #tpu.memory_space<vmem>>, %arg2: memref<3x256xf32, #tpu.memory_space<vmem>>, %arg3: memref<2x3xf32, #tpu.memory_space<vmem>>, %arg4: memref<16x64xf32, #tpu.memory_space<vmem>>) attributes {dimension_semantics = [], scalar_prefetch = 0 : i64, scratch_operands = 1 : i64, tpu.core_type = #tpu.core_type<tc>} {
    %c0 = arith.constant 0 : index
    %c0_0 = arith.constant 0 : index
    %0 = vector.load %arg0[%c0, %c0_0] : memref<16x16xf32, #tpu.memory_space<vmem>>, vector<16x16xf32>
    %c0_1 = arith.constant 0 : index
    %c0_2 = arith.constant 0 : index
    %1 = vector.load %arg1[%c0_1, %c0_2] : memref<240x256xf32, #tpu.memory_space<vmem>>, vector<16x256xf32>
    %cst = arith.constant dense<0.000000e+00> : vector<16x256xf32>
    %2 = tpu.matmul %0, %1, %cst {dimension_numbers = #tpu.dot_dimension_numbers<[1], [0], [0], [1], [0, 0, 1, 1], [], []>} : vector<16x16xf32>, vector<16x256xf32>, vector<16x256xf32> -> vector<16x256xf32>
    %c0_3 = arith.constant 0 : index
    %c0_4 = arith.constant 0 : index
    %3 = vector.load %arg2[%c0_3, %c0_4] : memref<3x256xf32, #tpu.memory_space<vmem>>, vector<1x256xf32>
    %4 = vector.broadcast %3 : vector<1x256xf32> to vector<16x256xf32>
    %5 = arith.addf %2, %4 : vector<16x256xf32>
    %cst_5 = arith.constant 0.000000e+00 : f32
    %6 = vector.broadcast %cst_5 : f32 to vector<2x64xf32>
    %cst_6 = arith.constant 0.000000e+00 : f32
    %7 = vector.broadcast %cst_6 : f32 to vector<2x64xf32>
    %c16 = arith.constant 16 : index
    %c0_7 = arith.constant 0 : index
    %8 = vector.load %arg1[%c16, %c0_7] : memref<240x256xf32, #tpu.memory_space<vmem>>, vector<64x256xf32>
    %cst_8 = arith.constant dense<0.000000e+00> : vector<2x256xf32>
    %9 = tpu.matmul %6, %8, %cst_8 {dimension_numbers = #tpu.dot_dimension_numbers<[1], [0], [0], [1], [0, 0, 1, 1], [], []>} : vector<2x64xf32>, vector<64x256xf32>, vector<2x256xf32> -> vector<2x256xf32>
    %10 = vector.extract_strided_slice %5 {offsets = [0, 0], sizes = [2, 256], strides = [1, 1]} : vector<16x256xf32> to vector<2x256xf32>
    %11 = arith.addf %9, %10 : vector<2x256xf32>
    %12 = vector.extract_strided_slice %11 {offsets = [0, 0], sizes = [2, 64], strides = [1, 1]} : vector<2x256xf32> to vector<2x64xf32>
    %13 = arith.negf %12 : vector<2x64xf32>
    %14 = math.exp %13 : vector<2x64xf32>
    %cst_9 = arith.constant 1.000000e+00 : f32
    %15 = vector.broadcast %cst_9 : f32 to vector<2x64xf32>
    %16 = arith.addf %15, %14 : vector<2x64xf32>
    %17 = arith.divf %15, %16 : vector<2x64xf32>
    %18 = vector.extract_strided_slice %11 {offsets = [0, 64], sizes = [2, 64], strides = [1, 1]} : vector<2x256xf32> to vector<2x64xf32>
    %19 = arith.negf %18 : vector<2x64xf32>
    %20 = math.exp %19 : vector<2x64xf32>
    %cst_10 = arith.constant 1.000000e+00 : f32
    %21 = vector.broadcast %cst_10 : f32 to vector<2x64xf32>
    %22 = arith.addf %21, %20 : vector<2x64xf32>
    %23 = arith.divf %21, %22 : vector<2x64xf32>
    %24 = vector.extract_strided_slice %11 {offsets = [0, 128], sizes = [2, 64], strides = [1, 1]} : vector<2x256xf32> to vector<2x64xf32>
    %25 = math.tanh %24 : vector<2x64xf32>
    %26 = vector.extract_strided_slice %11 {offsets = [0, 192], sizes = [2, 64], strides = [1, 1]} : vector<2x256xf32> to vector<2x64xf32>
    %27 = arith.negf %26 : vector<2x64xf32>
    %28 = math.exp %27 : vector<2x64xf32>
    %cst_11 = arith.constant 1.000000e+00 : f32
    %29 = vector.broadcast %cst_11 : f32 to vector<2x64xf32>
    %30 = arith.addf %29, %28 : vector<2x64xf32>
    %31 = arith.divf %29, %30 : vector<2x64xf32>
    %32 = arith.mulf %23, %7 : vector<2x64xf32>
    %33 = arith.mulf %17, %25 : vector<2x64xf32>
    %34 = arith.addf %32, %33 : vector<2x64xf32>
    %35 = math.tanh %34 : vector<2x64xf32>
    %36 = arith.mulf %31, %35 : vector<2x64xf32>
    %37 = vector.extract_strided_slice %36 {offsets = [0, 0], sizes = [2, 32], strides = [1, 1]} : vector<2x64xf32> to vector<2x32xf32>
    %c0_12 = arith.constant 0 : index
    %c0_13 = arith.constant 0 : index
    %38 = vector.load %arg4[%c0_12, %c0_13] : memref<16x64xf32, #tpu.memory_space<vmem>>, vector<2x32xf32>
    tpu.vector_store %arg4[%c0_12, %c0_13], %37 {strides = array<i32>} : memref<16x64xf32, #tpu.memory_space<vmem>>, vector<2x32xf32>,
    %39 = vector.extract_strided_slice %36 {offsets = [0, 32], sizes = [2, 32], strides = [1, 1]} : vector<2x64xf32> to vector<2x32xf32>
    %c14 = arith.constant 14 : index
    %c32 = arith.constant 32 : index
    %40 = vector.load %arg4[%c14, %c32] : memref<16x64xf32, #tpu.memory_space<vmem>>, vector<2x32xf32>
    tpu.vector_store %arg4[%c14, %c32], %39 {strides = array<i32>} : memref<16x64xf32, #tpu.memory_space<vmem>>, vector<2x32xf32>,
    %c16_14 = arith.constant 16 : index
    %c0_15 = arith.constant 0 : index
    %41 = vector.load %arg1[%c16_14, %c0_15] : memref<240x256xf32, #tpu.memory_space<vmem>>, vector<64x256xf32>
    %cst_16 = arith.constant dense<0.000000e+00> : vector<2x256xf32>
    %42 = tpu.matmul %36, %41, %cst_16 {dimension_numbers = #tpu.dot_dimension_numbers<[1], [0], [0], [1], [0, 0, 1, 1], [], []>} : vector<2x64xf32>, vector<64x256xf32>, vector<2x256xf32> -> vector<2x256xf32>
    %43 = vector.extract_strided_slice %5 {offsets = [2, 0], sizes = [2, 256], strides = [1, 1]} : vector<16x256xf32> to vector<2x256xf32>
    %44 = arith.addf %42, %43 : vector<2x256xf32>
    %45 = vector.extract_strided_slice %44 {offsets = [0, 0], sizes = [2, 64], strides = [1, 1]} : vector<2x256xf32> to vector<2x64xf32>
    %46 = arith.negf %45 : vector<2x64xf32>
    %47 = math.exp %46 : vector<2x64xf32>
    %cst_17 = arith.constant 1.000000e+00 : f32
    %48 = vector.broadcast %cst_17 : f32 to vector<2x64xf32>
    %49 = arith.addf %48, %47 : vector<2x64xf32>
    %50 = arith.divf %48, %49 : vector<2x64xf32>
    %51 = vector.extract_strided_slice %44 {offsets = [0, 64], sizes = [2, 64], strides = [1, 1]} : vector<2x256xf32> to vector<2x64xf32>
    %52 = arith.negf %51 : vector<2x64xf32>
    %53 = math.exp %52 : vector<2x64xf32>
    %cst_18 = arith.constant 1.000000e+00 : f32
    %54 = vector.broadcast %cst_18 : f32 to vector<2x64xf32>
    %55 = arith.addf %54, %53 : vector<2x64xf32>
    %56 = arith.divf %54, %55 : vector<2x64xf32>
    %57 = vector.extract_strided_slice %44 {offsets = [0, 128], sizes = [2, 64], strides = [1, 1]} : vector<2x256xf32> to vector<2x64xf32>
    %58 = math.tanh %57 : vector<2x64xf32>
    %59 = vector.extract_strided_slice %44 {offsets = [0, 192], sizes = [2, 64], strides = [1, 1]} : vector<2x256xf32> to vector<2x64xf32>
    %60 = arith.negf %59 : vector<2x64xf32>
    %61 = math.exp %60 : vector<2x64xf32>
    %cst_19 = arith.constant 1.000000e+00 : f32
    %62 = vector.broadcast %cst_19 : f32 to vector<2x64xf32>
    %63 = arith.addf %62, %61 : vector<2x64xf32>
    %64 = arith.divf %62, %63 : vector<2x64xf32>
    %65 = arith.mulf %56, %34 : vector<2x64xf32>
    %66 = arith.mulf %50, %58 : vector<2x64xf32>
    %67 = arith.addf %65, %66 : vector<2x64xf32>
    %68 = math.tanh %67 : vector<2x64xf32>
    %69 = arith.mulf %64, %68 : vector<2x64xf32>
    %70 = vector.extract_strided_slice %69 {offsets = [0, 0], sizes = [2, 32], strides = [1, 1]} : vector<2x64xf32> to vector<2x32xf32>
    %c2 = arith.constant 2 : index
    %c0_20 = arith.constant 0 : index
    %71 = vector.load %arg4[%c2, %c0_20] : memref<16x64xf32, #tpu.memory_space<vmem>>, vector<2x32xf32>
    tpu.vector_store %arg4[%c2, %c0_20], %70 {strides = array<i32>} : memref<16x64xf32, #tpu.memory_space<vmem>>, vector<2x32xf32>,
    %72 = vector.extract_strided_slice %69 {offsets = [0, 32], sizes = [2, 32], strides = [1, 1]} : vector<2x64xf32> to vector<2x32xf32>
    %c12 = arith.constant 12 : index
    %c32_21 = arith.constant 32 : index
    %73 = vector.load %arg4[%c12, %c32_21] : memref<16x64xf32, #tpu.memory_space<vmem>>, vector<2x32xf32>
    tpu.vector_store %arg4[%c12, %c32_21], %72 {strides = array<i32>} : memref<16x64xf32, #tpu.memory_space<vmem>>, vector<2x32xf32>,
    %c16_22 = arith.constant 16 : index
    %c0_23 = arith.constant 0 : index
    %74 = vector.load %arg1[%c16_22, %c0_23] : memref<240x256xf32, #tpu.memory_space<vmem>>, vector<64x256xf32>
    %cst_24 = arith.constant dense<0.000000e+00> : vector<2x256xf32>
    %75 = tpu.matmul %69, %74, %cst_24 {dimension_numbers = #tpu.dot_dimension_numbers<[1], [0], [0], [1], [0, 0, 1, 1], [], []>} : vector<2x64xf32>, vector<64x256xf32>, vector<2x256xf32> -> vector<2x256xf32>
    %76 = vector.extract_strided_slice %5 {offsets = [4, 0], sizes = [2, 256], strides = [1, 1]} : vector<16x256xf32> to vector<2x256xf32>
    %77 = arith.addf %75, %76 : vector<2x256xf32>
    %78 = vector.extract_strided_slice %77 {offsets = [0, 0], sizes = [2, 64], strides = [1, 1]} : vector<2x256xf32> to vector<2x64xf32>
    %79 = arith.negf %78 : vector<2x64xf32>
    %80 = math.exp %79 : vector<2x64xf32>
    %cst_25 = arith.constant 1.000000e+00 : f32
    %81 = vector.broadcast %cst_25 : f32 to vector<2x64xf32>
    %82 = arith.addf %81, %80 : vector<2x64xf32>
    %83 = arith.divf %81, %82 : vector<2x64xf32>
    %84 = vector.extract_strided_slice %77 {offsets = [0, 64], sizes = [2, 64], strides = [1, 1]} : vector<2x256xf32> to vector<2x64xf32>
    %85 = arith.negf %84 : vector<2x64xf32>
    %86 = math.exp %85 : vector<2x64xf32>
    %cst_26 = arith.constant 1.000000e+00 : f32
    %87 = vector.broadcast %cst_26 : f32 to vector<2x64xf32>
    %88 = arith.addf %87, %86 : vector<2x64xf32>
    %89 = arith.divf %87, %88 : vector<2x64xf32>
    %90 = vector.extract_strided_slice %77 {offsets = [0, 128], sizes = [2, 64], strides = [1, 1]} : vector<2x256xf32> to vector<2x64xf32>
    %91 = math.tanh %90 : vector<2x64xf32>
    %92 = vector.extract_strided_slice %77 {offsets = [0, 192], sizes = [2, 64], strides = [1, 1]} : vector<2x256xf32> to vector<2x64xf32>
    %93 = arith.negf %92 : vector<2x64xf32>
    %94 = math.exp %93 : vector<2x64xf32>
    %cst_27 = arith.constant 1.000000e+00 : f32
    %95 = vector.broadcast %cst_27 : f32 to vector<2x64xf32>
    %96 = arith.addf %95, %94 : vector<2x64xf32>
    %97 = arith.divf %95, %96 : vector<2x64xf32>
    %98 = arith.mulf %89, %67 : vector<2x64xf32>
    %99 = arith.mulf %83, %91 : vector<2x64xf32>
    %100 = arith.addf %98, %99 : vector<2x64xf32>
    %101 = math.tanh %100 : vector<2x64xf32>
    %102 = arith.mulf %97, %101 : vector<2x64xf32>
    %103 = vector.extract_strided_slice %102 {offsets = [0, 0], sizes = [2, 32], strides = [1, 1]} : vector<2x64xf32> to vector<2x32xf32>
    %c4 = arith.constant 4 : index
    %c0_28 = arith.constant 0 : index
    %104 = vector.load %arg4[%c4, %c0_28] : memref<16x64xf32, #tpu.memory_space<vmem>>, vector<2x32xf32>
    tpu.vector_store %arg4[%c4, %c0_28], %103 {strides = array<i32>} : memref<16x64xf32, #tpu.memory_space<vmem>>, vector<2x32xf32>,
    %105 = vector.extract_strided_slice %102 {offsets = [0, 32], sizes = [2, 32], strides = [1, 1]} : vector<2x64xf32> to vector<2x32xf32>
    %c10 = arith.constant 10 : index
    %c32_29 = arith.constant 32 : index
    %106 = vector.load %arg4[%c10, %c32_29] : memref<16x64xf32, #tpu.memory_space<vmem>>, vector<2x32xf32>
    tpu.vector_store %arg4[%c10, %c32_29], %105 {strides = array<i32>} : memref<16x64xf32, #tpu.memory_space<vmem>>, vector<2x32xf32>,
    %c16_30 = arith.constant 16 : index
    %c0_31 = arith.constant 0 : index
    %107 = vector.load %arg1[%c16_30, %c0_31] : memref<240x256xf32, #tpu.memory_space<vmem>>, vector<64x256xf32>
    %cst_32 = arith.constant dense<0.000000e+00> : vector<2x256xf32>
    %108 = tpu.matmul %102, %107, %cst_32 {dimension_numbers = #tpu.dot_dimension_numbers<[1], [0], [0], [1], [0, 0, 1, 1], [], []>} : vector<2x64xf32>, vector<64x256xf32>, vector<2x256xf32> -> vector<2x256xf32>
    %109 = vector.extract_strided_slice %5 {offsets = [6, 0], sizes = [2, 256], strides = [1, 1]} : vector<16x256xf32> to vector<2x256xf32>
    %110 = arith.addf %108, %109 : vector<2x256xf32>
    %111 = vector.extract_strided_slice %110 {offsets = [0, 0], sizes = [2, 64], strides = [1, 1]} : vector<2x256xf32> to vector<2x64xf32>
    %112 = arith.negf %111 : vector<2x64xf32>
    %113 = math.exp %112 : vector<2x64xf32>
    %cst_33 = arith.constant 1.000000e+00 : f32
    %114 = vector.broadcast %cst_33 : f32 to vector<2x64xf32>
    %115 = arith.addf %114, %113 : vector<2x64xf32>
    %116 = arith.divf %114, %115 : vector<2x64xf32>
    %117 = vector.extract_strided_slice %110 {offsets = [0, 64], sizes = [2, 64], strides = [1, 1]} : vector<2x256xf32> to vector<2x64xf32>
    %118 = arith.negf %117 : vector<2x64xf32>
    %119 = math.exp %118 : vector<2x64xf32>
    %cst_34 = arith.constant 1.000000e+00 : f32
    %120 = vector.broadcast %cst_34 : f32 to vector<2x64xf32>
    %121 = arith.addf %120, %119 : vector<2x64xf32>
    %122 = arith.divf %120, %121 : vector<2x64xf32>
    %123 = vector.extract_strided_slice %110 {offsets = [0, 128], sizes = [2, 64], strides = [1, 1]} : vector<2x256xf32> to vector<2x64xf32>
    %124 = math.tanh %123 : vector<2x64xf32>
    %125 = vector.extract_strided_slice %110 {offsets = [0, 192], sizes = [2, 64], strides = [1, 1]} : vector<2x256xf32> to vector<2x64xf32>
    %126 = arith.negf %125 : vector<2x64xf32>
    %127 = math.exp %126 : vector<2x64xf32>
    %cst_35 = arith.constant 1.000000e+00 : f32
    %128 = vector.broadcast %cst_35 : f32 to vector<2x64xf32>
    %129 = arith.addf %128, %127 : vector<2x64xf32>
    %130 = arith.divf %128, %129 : vector<2x64xf32>
    %131 = arith.mulf %122, %100 : vector<2x64xf32>
    %132 = arith.mulf %116, %124 : vector<2x64xf32>
    %133 = arith.addf %131, %132 : vector<2x64xf32>
    %134 = math.tanh %133 : vector<2x64xf32>
    %135 = arith.mulf %130, %134 : vector<2x64xf32>
    %136 = vector.extract_strided_slice %135 {offsets = [0, 0], sizes = [2, 32], strides = [1, 1]} : vector<2x64xf32> to vector<2x32xf32>
    %c6 = arith.constant 6 : index
    %c0_36 = arith.constant 0 : index
    %137 = vector.load %arg4[%c6, %c0_36] : memref<16x64xf32, #tpu.memory_space<vmem>>, vector<2x32xf32>
    tpu.vector_store %arg4[%c6, %c0_36], %136 {strides = array<i32>} : memref<16x64xf32, #tpu.memory_space<vmem>>, vector<2x32xf32>,
    %138 = vector.extract_strided_slice %135 {offsets = [0, 32], sizes = [2, 32], strides = [1, 1]} : vector<2x64xf32> to vector<2x32xf32>
    %c8 = arith.constant 8 : index
    %c32_37 = arith.constant 32 : index
    %139 = vector.load %arg4[%c8, %c32_37] : memref<16x64xf32, #tpu.memory_space<vmem>>, vector<2x32xf32>
    tpu.vector_store %arg4[%c8, %c32_37], %138 {strides = array<i32>} : memref<16x64xf32, #tpu.memory_space<vmem>>, vector<2x32xf32>,
    %c16_38 = arith.constant 16 : index
    %c0_39 = arith.constant 0 : index
    %140 = vector.load %arg1[%c16_38, %c0_39] : memref<240x256xf32, #tpu.memory_space<vmem>>, vector<64x256xf32>
    %cst_40 = arith.constant dense<0.000000e+00> : vector<2x256xf32>
    %141 = tpu.matmul %135, %140, %cst_40 {dimension_numbers = #tpu.dot_dimension_numbers<[1], [0], [0], [1], [0, 0, 1, 1], [], []>} : vector<2x64xf32>, vector<64x256xf32>, vector<2x256xf32> -> vector<2x256xf32>
    %142 = vector.extract_strided_slice %5 {offsets = [8, 0], sizes = [2, 256], strides = [1, 1]} : vector<16x256xf32> to vector<2x256xf32>
    %143 = arith.addf %141, %142 : vector<2x256xf32>
    %144 = vector.extract_strided_slice %143 {offsets = [0, 0], sizes = [2, 64], strides = [1, 1]} : vector<2x256xf32> to vector<2x64xf32>
    %145 = arith.negf %144 : vector<2x64xf32>
    %146 = math.exp %145 : vector<2x64xf32>
    %cst_41 = arith.constant 1.000000e+00 : f32
    %147 = vector.broadcast %cst_41 : f32 to vector<2x64xf32>
    %148 = arith.addf %147, %146 : vector<2x64xf32>
    %149 = arith.divf %147, %148 : vector<2x64xf32>
    %150 = vector.extract_strided_slice %143 {offsets = [0, 64], sizes = [2, 64], strides = [1, 1]} : vector<2x256xf32> to vector<2x64xf32>
    %151 = arith.negf %150 : vector<2x64xf32>
    %152 = math.exp %151 : vector<2x64xf32>
    %cst_42 = arith.constant 1.000000e+00 : f32
    %153 = vector.broadcast %cst_42 : f32 to vector<2x64xf32>
    %154 = arith.addf %153, %152 : vector<2x64xf32>
    %155 = arith.divf %153, %154 : vector<2x64xf32>
    %156 = vector.extract_strided_slice %143 {offsets = [0, 128], sizes = [2, 64], strides = [1, 1]} : vector<2x256xf32> to vector<2x64xf32>
    %157 = math.tanh %156 : vector<2x64xf32>
    %158 = vector.extract_strided_slice %143 {offsets = [0, 192], sizes = [2, 64], strides = [1, 1]} : vector<2x256xf32> to vector<2x64xf32>
    %159 = arith.negf %158 : vector<2x64xf32>
    %160 = math.exp %159 : vector<2x64xf32>
    %cst_43 = arith.constant 1.000000e+00 : f32
    %161 = vector.broadcast %cst_43 : f32 to vector<2x64xf32>
    %162 = arith.addf %161, %160 : vector<2x64xf32>
    %163 = arith.divf %161, %162 : vector<2x64xf32>
    %164 = arith.mulf %155, %133 : vector<2x64xf32>
    %165 = arith.mulf %149, %157 : vector<2x64xf32>
    %166 = arith.addf %164, %165 : vector<2x64xf32>
    %167 = math.tanh %166 : vector<2x64xf32>
    %168 = arith.mulf %163, %167 : vector<2x64xf32>
    %169 = vector.extract_strided_slice %168 {offsets = [0, 0], sizes = [2, 32], strides = [1, 1]} : vector<2x64xf32> to vector<2x32xf32>
    %c8_44 = arith.constant 8 : index
    %c0_45 = arith.constant 0 : index
    %170 = vector.load %arg4[%c8_44, %c0_45] : memref<16x64xf32, #tpu.memory_space<vmem>>, vector<2x32xf32>
    tpu.vector_store %arg4[%c8_44, %c0_45], %169 {strides = array<i32>} : memref<16x64xf32, #tpu.memory_space<vmem>>, vector<2x32xf32>,
    %171 = vector.extract_strided_slice %168 {offsets = [0, 32], sizes = [2, 32], strides = [1, 1]} : vector<2x64xf32> to vector<2x32xf32>
    %c6_46 = arith.constant 6 : index
    %c32_47 = arith.constant 32 : index
    %172 = vector.load %arg4[%c6_46, %c32_47] : memref<16x64xf32, #tpu.memory_space<vmem>>, vector<2x32xf32>
    tpu.vector_store %arg4[%c6_46, %c32_47], %171 {strides = array<i32>} : memref<16x64xf32, #tpu.memory_space<vmem>>, vector<2x32xf32>,
    %c16_48 = arith.constant 16 : index
    %c0_49 = arith.constant 0 : index
    %173 = vector.load %arg1[%c16_48, %c0_49] : memref<240x256xf32, #tpu.memory_space<vmem>>, vector<64x256xf32>
    %cst_50 = arith.constant dense<0.000000e+00> : vector<2x256xf32>
    %174 = tpu.matmul %168, %173, %cst_50 {dimension_numbers = #tpu.dot_dimension_numbers<[1], [0], [0], [1], [0, 0, 1, 1], [], []>} : vector<2x64xf32>, vector<64x256xf32>, vector<2x256xf32> -> vector<2x256xf32>
    %175 = vector.extract_strided_slice %5 {offsets = [10, 0], sizes = [2, 256], strides = [1, 1]} : vector<16x256xf32> to vector<2x256xf32>
    %176 = arith.addf %174, %175 : vector<2x256xf32>
    %177 = vector.extract_strided_slice %176 {offsets = [0, 0], sizes = [2, 64], strides = [1, 1]} : vector<2x256xf32> to vector<2x64xf32>
    %178 = arith.negf %177 : vector<2x64xf32>
    %179 = math.exp %178 : vector<2x64xf32>
    %cst_51 = arith.constant 1.000000e+00 : f32
    %180 = vector.broadcast %cst_51 : f32 to vector<2x64xf32>
    %181 = arith.addf %180, %179 : vector<2x64xf32>
    %182 = arith.divf %180, %181 : vector<2x64xf32>
    %183 = vector.extract_strided_slice %176 {offsets = [0, 64], sizes = [2, 64], strides = [1, 1]} : vector<2x256xf32> to vector<2x64xf32>
    %184 = arith.negf %183 : vector<2x64xf32>
    %185 = math.exp %184 : vector<2x64xf32>
    %cst_52 = arith.constant 1.000000e+00 : f32
    %186 = vector.broadcast %cst_52 : f32 to vector<2x64xf32>
    %187 = arith.addf %186, %185 : vector<2x64xf32>
    %188 = arith.divf %186, %187 : vector<2x64xf32>
    %189 = vector.extract_strided_slice %176 {offsets = [0, 128], sizes = [2, 64], strides = [1, 1]} : vector<2x256xf32> to vector<2x64xf32>
    %190 = math.tanh %189 : vector<2x64xf32>
    %191 = vector.extract_strided_slice %176 {offsets = [0, 192], sizes = [2, 64], strides = [1, 1]} : vector<2x256xf32> to vector<2x64xf32>
    %192 = arith.negf %191 : vector<2x64xf32>
    %193 = math.exp %192 : vector<2x64xf32>
    %cst_53 = arith.constant 1.000000e+00 : f32
    %194 = vector.broadcast %cst_53 : f32 to vector<2x64xf32>
    %195 = arith.addf %194, %193 : vector<2x64xf32>
    %196 = arith.divf %194, %195 : vector<2x64xf32>
    %197 = arith.mulf %188, %166 : vector<2x64xf32>
    %198 = arith.mulf %182, %190 : vector<2x64xf32>
    %199 = arith.addf %197, %198 : vector<2x64xf32>
    %200 = math.tanh %199 : vector<2x64xf32>
    %201 = arith.mulf %196, %200 : vector<2x64xf32>
    %202 = vector.extract_strided_slice %201 {offsets = [0, 0], sizes = [2, 32], strides = [1, 1]} : vector<2x64xf32> to vector<2x32xf32>
    %c10_54 = arith.constant 10 : index
    %c0_55 = arith.constant 0 : index
    %203 = vector.load %arg4[%c10_54, %c0_55] : memref<16x64xf32, #tpu.memory_space<vmem>>, vector<2x32xf32>
    tpu.vector_store %arg4[%c10_54, %c0_55], %202 {strides = array<i32>} : memref<16x64xf32, #tpu.memory_space<vmem>>, vector<2x32xf32>,
    %204 = vector.extract_strided_slice %201 {offsets = [0, 32], sizes = [2, 32], strides = [1, 1]} : vector<2x64xf32> to vector<2x32xf32>
    %c4_56 = arith.constant 4 : index
    %c32_57 = arith.constant 32 : index
    %205 = vector.load %arg4[%c4_56, %c32_57] : memref<16x64xf32, #tpu.memory_space<vmem>>, vector<2x32xf32>
    tpu.vector_store %arg4[%c4_56, %c32_57], %204 {strides = array<i32>} : memref<16x64xf32, #tpu.memory_space<vmem>>, vector<2x32xf32>,
    %c16_58 = arith.constant 16 : index
    %c0_59 = arith.constant 0 : index
    %206 = vector.load %arg1[%c16_58, %c0_59] : memref<240x256xf32, #tpu.memory_space<vmem>>, vector<64x256xf32>
    %cst_60 = arith.constant dense<0.000000e+00> : vector<2x256xf32>
    %207 = tpu.matmul %201, %206, %cst_60 {dimension_numbers = #tpu.dot_dimension_numbers<[1], [0], [0], [1], [0, 0, 1, 1], [], []>} : vector<2x64xf32>, vector<64x256xf32>, vector<2x256xf32> -> vector<2x256xf32>
    %208 = vector.extract_strided_slice %5 {offsets = [12, 0], sizes = [2, 256], strides = [1, 1]} : vector<16x256xf32> to vector<2x256xf32>
    %209 = arith.addf %207, %208 : vector<2x256xf32>
    %210 = vector.extract_strided_slice %209 {offsets = [0, 0], sizes = [2, 64], strides = [1, 1]} : vector<2x256xf32> to vector<2x64xf32>
    %211 = arith.negf %210 : vector<2x64xf32>
    %212 = math.exp %211 : vector<2x64xf32>
    %cst_61 = arith.constant 1.000000e+00 : f32
    %213 = vector.broadcast %cst_61 : f32 to vector<2x64xf32>
    %214 = arith.addf %213, %212 : vector<2x64xf32>
    %215 = arith.divf %213, %214 : vector<2x64xf32>
    %216 = vector.extract_strided_slice %209 {offsets = [0, 64], sizes = [2, 64], strides = [1, 1]} : vector<2x256xf32> to vector<2x64xf32>
    %217 = arith.negf %216 : vector<2x64xf32>
    %218 = math.exp %217 : vector<2x64xf32>
    %cst_62 = arith.constant 1.000000e+00 : f32
    %219 = vector.broadcast %cst_62 : f32 to vector<2x64xf32>
    %220 = arith.addf %219, %218 : vector<2x64xf32>
    %221 = arith.divf %219, %220 : vector<2x64xf32>
    %222 = vector.extract_strided_slice %209 {offsets = [0, 128], sizes = [2, 64], strides = [1, 1]} : vector<2x256xf32> to vector<2x64xf32>
    %223 = math.tanh %222 : vector<2x64xf32>
    %224 = vector.extract_strided_slice %209 {offsets = [0, 192], sizes = [2, 64], strides = [1, 1]} : vector<2x256xf32> to vector<2x64xf32>
    %225 = arith.negf %224 : vector<2x64xf32>
    %226 = math.exp %225 : vector<2x64xf32>
    %cst_63 = arith.constant 1.000000e+00 : f32
    %227 = vector.broadcast %cst_63 : f32 to vector<2x64xf32>
    %228 = arith.addf %227, %226 : vector<2x64xf32>
    %229 = arith.divf %227, %228 : vector<2x64xf32>
    %230 = arith.mulf %221, %199 : vector<2x64xf32>
    %231 = arith.mulf %215, %223 : vector<2x64xf32>
    %232 = arith.addf %230, %231 : vector<2x64xf32>
    %233 = math.tanh %232 : vector<2x64xf32>
    %234 = arith.mulf %229, %233 : vector<2x64xf32>
    %235 = vector.extract_strided_slice %234 {offsets = [0, 0], sizes = [2, 32], strides = [1, 1]} : vector<2x64xf32> to vector<2x32xf32>
    %c12_64 = arith.constant 12 : index
    %c0_65 = arith.constant 0 : index
    %236 = vector.load %arg4[%c12_64, %c0_65] : memref<16x64xf32, #tpu.memory_space<vmem>>, vector<2x32xf32>
    tpu.vector_store %arg4[%c12_64, %c0_65], %235 {strides = array<i32>} : memref<16x64xf32, #tpu.memory_space<vmem>>, vector<2x32xf32>,
    %237 = vector.extract_strided_slice %234 {offsets = [0, 32], sizes = [2, 32], strides = [1, 1]} : vector<2x64xf32> to vector<2x32xf32>
    %c2_66 = arith.constant 2 : index
    %c32_67 = arith.constant 32 : index
    %238 = vector.load %arg4[%c2_66, %c32_67] : memref<16x64xf32, #tpu.memory_space<vmem>>, vector<2x32xf32>
    tpu.vector_store %arg4[%c2_66, %c32_67], %237 {strides = array<i32>} : memref<16x64xf32, #tpu.memory_space<vmem>>, vector<2x32xf32>,
    %c16_68 = arith.constant 16 : index
    %c0_69 = arith.constant 0 : index
    %239 = vector.load %arg1[%c16_68, %c0_69] : memref<240x256xf32, #tpu.memory_space<vmem>>, vector<64x256xf32>
    %cst_70 = arith.constant dense<0.000000e+00> : vector<2x256xf32>
    %240 = tpu.matmul %234, %239, %cst_70 {dimension_numbers = #tpu.dot_dimension_numbers<[1], [0], [0], [1], [0, 0, 1, 1], [], []>} : vector<2x64xf32>, vector<64x256xf32>, vector<2x256xf32> -> vector<2x256xf32>
    %241 = vector.extract_strided_slice %5 {offsets = [14, 0], sizes = [2, 256], strides = [1, 1]} : vector<16x256xf32> to vector<2x256xf32>
    %242 = arith.addf %240, %241 : vector<2x256xf32>
    %243 = vector.extract_strided_slice %242 {offsets = [0, 0], sizes = [2, 64], strides = [1, 1]} : vector<2x256xf32> to vector<2x64xf32>
    %244 = arith.negf %243 : vector<2x64xf32>
    %245 = math.exp %244 : vector<2x64xf32>
    %cst_71 = arith.constant 1.000000e+00 : f32
    %246 = vector.broadcast %cst_71 : f32 to vector<2x64xf32>
    %247 = arith.addf %246, %245 : vector<2x64xf32>
    %248 = arith.divf %246, %247 : vector<2x64xf32>
    %249 = vector.extract_strided_slice %242 {offsets = [0, 64], sizes = [2, 64], strides = [1, 1]} : vector<2x256xf32> to vector<2x64xf32>
    %250 = arith.negf %249 : vector<2x64xf32>
    %251 = math.exp %250 : vector<2x64xf32>
    %cst_72 = arith.constant 1.000000e+00 : f32
    %252 = vector.broadcast %cst_72 : f32 to vector<2x64xf32>
    %253 = arith.addf %252, %251 : vector<2x64xf32>
    %254 = arith.divf %252, %253 : vector<2x64xf32>
    %255 = vector.extract_strided_slice %242 {offsets = [0, 128], sizes = [2, 64], strides = [1, 1]} : vector<2x256xf32> to vector<2x64xf32>
    %256 = math.tanh %255 : vector<2x64xf32>
    %257 = vector.extract_strided_slice %242 {offsets = [0, 192], sizes = [2, 64], strides = [1, 1]} : vector<2x256xf32> to vector<2x64xf32>
    %258 = arith.negf %257 : vector<2x64xf32>
    %259 = math.exp %258 : vector<2x64xf32>
    %cst_73 = arith.constant 1.000000e+00 : f32
    %260 = vector.broadcast %cst_73 : f32 to vector<2x64xf32>
    %261 = arith.addf %260, %259 : vector<2x64xf32>
    %262 = arith.divf %260, %261 : vector<2x64xf32>
    %263 = arith.mulf %254, %232 : vector<2x64xf32>
    %264 = arith.mulf %248, %256 : vector<2x64xf32>
    %265 = arith.addf %263, %264 : vector<2x64xf32>
    %266 = math.tanh %265 : vector<2x64xf32>
    %267 = arith.mulf %262, %266 : vector<2x64xf32>
    %268 = vector.extract_strided_slice %267 {offsets = [0, 0], sizes = [2, 32], strides = [1, 1]} : vector<2x64xf32> to vector<2x32xf32>
    %c14_74 = arith.constant 14 : index
    %c0_75 = arith.constant 0 : index
    %269 = vector.load %arg4[%c14_74, %c0_75] : memref<16x64xf32, #tpu.memory_space<vmem>>, vector<2x32xf32>
    tpu.vector_store %arg4[%c14_74, %c0_75], %268 {strides = array<i32>} : memref<16x64xf32, #tpu.memory_space<vmem>>, vector<2x32xf32>,
    %270 = vector.extract_strided_slice %267 {offsets = [0, 32], sizes = [2, 32], strides = [1, 1]} : vector<2x64xf32> to vector<2x32xf32>
    %c0_76 = arith.constant 0 : index
    %c32_77 = arith.constant 32 : index
    %271 = vector.load %arg4[%c0_76, %c32_77] : memref<16x64xf32, #tpu.memory_space<vmem>>, vector<2x32xf32>
    tpu.vector_store %arg4[%c0_76, %c32_77], %270 {strides = array<i32>} : memref<16x64xf32, #tpu.memory_space<vmem>>, vector<2x32xf32>,
    %c0_78 = arith.constant 0 : index
    %c0_79 = arith.constant 0 : index
    %272 = vector.load %arg4[%c0_78, %c0_79] : memref<16x64xf32, #tpu.memory_space<vmem>>, vector<16x64xf32>
    %c80 = arith.constant 80 : index
    %c0_80 = arith.constant 0 : index
    %273 = vector.load %arg1[%c80, %c0_80] : memref<240x256xf32, #tpu.memory_space<vmem>>, vector<64x256xf32>
    %cst_81 = arith.constant dense<0.000000e+00> : vector<16x256xf32>
    %274 = tpu.matmul %272, %273, %cst_81 {dimension_numbers = #tpu.dot_dimension_numbers<[1], [0], [0], [1], [0, 0, 1, 1], [], []>} : vector<16x64xf32>, vector<64x256xf32>, vector<16x256xf32> -> vector<16x256xf32>
    %c1 = arith.constant 1 : index
    %c0_82 = arith.constant 0 : index
    %275 = vector.load %arg2[%c1, %c0_82] : memref<3x256xf32, #tpu.memory_space<vmem>>, vector<1x256xf32>
    %276 = vector.broadcast %275 : vector<1x256xf32> to vector<16x256xf32>
    %277 = arith.addf %274, %276 : vector<16x256xf32>
    %cst_83 = arith.constant 0.000000e+00 : f32
    %278 = vector.broadcast %cst_83 : f32 to vector<2x32xf32>
    %cst_84 = arith.constant 0.000000e+00 : f32
    %279 = vector.broadcast %cst_84 : f32 to vector<2x32xf32>
    %c144 = arith.constant 144 : index
    %c0_85 = arith.constant 0 : index
    %280 = vector.load %arg1[%c144, %c0_85] : memref<240x256xf32, #tpu.memory_space<vmem>>, vector<32x128xf32>
    %cst_86 = arith.constant dense<0.000000e+00> : vector<2x128xf32>
    %281 = tpu.matmul %278, %280, %cst_86 {dimension_numbers = #tpu.dot_dimension_numbers<[1], [0], [0], [1], [0, 0, 1, 1], [], []>} : vector<2x32xf32>, vector<32x128xf32>, vector<2x128xf32> -> vector<2x128xf32>
    %282 = vector.extract_strided_slice %277 {offsets = [0, 0], sizes = [2, 128], strides = [1, 1]} : vector<16x256xf32> to vector<2x128xf32>
    %283 = arith.addf %281, %282 : vector<2x128xf32>
    %284 = vector.extract_strided_slice %283 {offsets = [0, 0], sizes = [2, 32], strides = [1, 1]} : vector<2x128xf32> to vector<2x32xf32>
    %285 = arith.negf %284 : vector<2x32xf32>
    %286 = math.exp %285 : vector<2x32xf32>
    %cst_87 = arith.constant 1.000000e+00 : f32
    %287 = vector.broadcast %cst_87 : f32 to vector<2x32xf32>
    %288 = arith.addf %287, %286 : vector<2x32xf32>
    %289 = arith.divf %287, %288 : vector<2x32xf32>
    %290 = vector.extract_strided_slice %283 {offsets = [0, 32], sizes = [2, 32], strides = [1, 1]} : vector<2x128xf32> to vector<2x32xf32>
    %291 = arith.negf %290 : vector<2x32xf32>
    %292 = math.exp %291 : vector<2x32xf32>
    %cst_88 = arith.constant 1.000000e+00 : f32
    %293 = vector.broadcast %cst_88 : f32 to vector<2x32xf32>
    %294 = arith.addf %293, %292 : vector<2x32xf32>
    %295 = arith.divf %293, %294 : vector<2x32xf32>
    %296 = vector.extract_strided_slice %283 {offsets = [0, 64], sizes = [2, 32], strides = [1, 1]} : vector<2x128xf32> to vector<2x32xf32>
    %297 = math.tanh %296 : vector<2x32xf32>
    %298 = vector.extract_strided_slice %283 {offsets = [0, 96], sizes = [2, 32], strides = [1, 1]} : vector<2x128xf32> to vector<2x32xf32>
    %299 = arith.negf %298 : vector<2x32xf32>
    %300 = math.exp %299 : vector<2x32xf32>
    %cst_89 = arith.constant 1.000000e+00 : f32
    %301 = vector.broadcast %cst_89 : f32 to vector<2x32xf32>
    %302 = arith.addf %301, %300 : vector<2x32xf32>
    %303 = arith.divf %301, %302 : vector<2x32xf32>
    %304 = arith.mulf %295, %279 : vector<2x32xf32>
    %305 = arith.mulf %289, %297 : vector<2x32xf32>
    %306 = arith.addf %304, %305 : vector<2x32xf32>
    %307 = math.tanh %306 : vector<2x32xf32>
    %308 = arith.mulf %303, %307 : vector<2x32xf32>
    %c144_90 = arith.constant 144 : index
    %c0_91 = arith.constant 0 : index
    %309 = vector.load %arg1[%c144_90, %c0_91] : memref<240x256xf32, #tpu.memory_space<vmem>>, vector<32x128xf32>
    %cst_92 = arith.constant dense<0.000000e+00> : vector<2x128xf32>
    %310 = tpu.matmul %308, %309, %cst_92 {dimension_numbers = #tpu.dot_dimension_numbers<[1], [0], [0], [1], [0, 0, 1, 1], [], []>} : vector<2x32xf32>, vector<32x128xf32>, vector<2x128xf32> -> vector<2x128xf32>
    %311 = vector.extract_strided_slice %277 {offsets = [2, 0], sizes = [2, 128], strides = [1, 1]} : vector<16x256xf32> to vector<2x128xf32>
    %312 = arith.addf %310, %311 : vector<2x128xf32>
    %313 = vector.extract_strided_slice %312 {offsets = [0, 0], sizes = [2, 32], strides = [1, 1]} : vector<2x128xf32> to vector<2x32xf32>
    %314 = arith.negf %313 : vector<2x32xf32>
    %315 = math.exp %314 : vector<2x32xf32>
    %cst_93 = arith.constant 1.000000e+00 : f32
    %316 = vector.broadcast %cst_93 : f32 to vector<2x32xf32>
    %317 = arith.addf %316, %315 : vector<2x32xf32>
    %318 = arith.divf %316, %317 : vector<2x32xf32>
    %319 = vector.extract_strided_slice %312 {offsets = [0, 32], sizes = [2, 32], strides = [1, 1]} : vector<2x128xf32> to vector<2x32xf32>
    %320 = arith.negf %319 : vector<2x32xf32>
    %321 = math.exp %320 : vector<2x32xf32>
    %cst_94 = arith.constant 1.000000e+00 : f32
    %322 = vector.broadcast %cst_94 : f32 to vector<2x32xf32>
    %323 = arith.addf %322, %321 : vector<2x32xf32>
    %324 = arith.divf %322, %323 : vector<2x32xf32>
    %325 = vector.extract_strided_slice %312 {offsets = [0, 64], sizes = [2, 32], strides = [1, 1]} : vector<2x128xf32> to vector<2x32xf32>
    %326 = math.tanh %325 : vector<2x32xf32>
    %327 = vector.extract_strided_slice %312 {offsets = [0, 96], sizes = [2, 32], strides = [1, 1]} : vector<2x128xf32> to vector<2x32xf32>
    %328 = arith.negf %327 : vector<2x32xf32>
    %329 = math.exp %328 : vector<2x32xf32>
    %cst_95 = arith.constant 1.000000e+00 : f32
    %330 = vector.broadcast %cst_95 : f32 to vector<2x32xf32>
    %331 = arith.addf %330, %329 : vector<2x32xf32>
    %332 = arith.divf %330, %331 : vector<2x32xf32>
    %333 = arith.mulf %324, %306 : vector<2x32xf32>
    %334 = arith.mulf %318, %326 : vector<2x32xf32>
    %335 = arith.addf %333, %334 : vector<2x32xf32>
    %336 = math.tanh %335 : vector<2x32xf32>
    %337 = arith.mulf %332, %336 : vector<2x32xf32>
    %c144_96 = arith.constant 144 : index
    %c0_97 = arith.constant 0 : index
    %338 = vector.load %arg1[%c144_96, %c0_97] : memref<240x256xf32, #tpu.memory_space<vmem>>, vector<32x128xf32>
    %cst_98 = arith.constant dense<0.000000e+00> : vector<2x128xf32>
    %339 = tpu.matmul %337, %338, %cst_98 {dimension_numbers = #tpu.dot_dimension_numbers<[1], [0], [0], [1], [0, 0, 1, 1], [], []>} : vector<2x32xf32>, vector<32x128xf32>, vector<2x128xf32> -> vector<2x128xf32>
    %340 = vector.extract_strided_slice %277 {offsets = [4, 0], sizes = [2, 128], strides = [1, 1]} : vector<16x256xf32> to vector<2x128xf32>
    %341 = arith.addf %339, %340 : vector<2x128xf32>
    %342 = vector.extract_strided_slice %341 {offsets = [0, 0], sizes = [2, 32], strides = [1, 1]} : vector<2x128xf32> to vector<2x32xf32>
    %343 = arith.negf %342 : vector<2x32xf32>
    %344 = math.exp %343 : vector<2x32xf32>
    %cst_99 = arith.constant 1.000000e+00 : f32
    %345 = vector.broadcast %cst_99 : f32 to vector<2x32xf32>
    %346 = arith.addf %345, %344 : vector<2x32xf32>
    %347 = arith.divf %345, %346 : vector<2x32xf32>
    %348 = vector.extract_strided_slice %341 {offsets = [0, 32], sizes = [2, 32], strides = [1, 1]} : vector<2x128xf32> to vector<2x32xf32>
    %349 = arith.negf %348 : vector<2x32xf32>
    %350 = math.exp %349 : vector<2x32xf32>
    %cst_100 = arith.constant 1.000000e+00 : f32
    %351 = vector.broadcast %cst_100 : f32 to vector<2x32xf32>
    %352 = arith.addf %351, %350 : vector<2x32xf32>
    %353 = arith.divf %351, %352 : vector<2x32xf32>
    %354 = vector.extract_strided_slice %341 {offsets = [0, 64], sizes = [2, 32], strides = [1, 1]} : vector<2x128xf32> to vector<2x32xf32>
    %355 = math.tanh %354 : vector<2x32xf32>
    %356 = vector.extract_strided_slice %341 {offsets = [0, 96], sizes = [2, 32], strides = [1, 1]} : vector<2x128xf32> to vector<2x32xf32>
    %357 = arith.negf %356 : vector<2x32xf32>
    %358 = math.exp %357 : vector<2x32xf32>
    %cst_101 = arith.constant 1.000000e+00 : f32
    %359 = vector.broadcast %cst_101 : f32 to vector<2x32xf32>
    %360 = arith.addf %359, %358 : vector<2x32xf32>
    %361 = arith.divf %359, %360 : vector<2x32xf32>
    %362 = arith.mulf %353, %335 : vector<2x32xf32>
    %363 = arith.mulf %347, %355 : vector<2x32xf32>
    %364 = arith.addf %362, %363 : vector<2x32xf32>
    %365 = math.tanh %364 : vector<2x32xf32>
    %366 = arith.mulf %361, %365 : vector<2x32xf32>
    %c144_102 = arith.constant 144 : index
    %c0_103 = arith.constant 0 : index
    %367 = vector.load %arg1[%c144_102, %c0_103] : memref<240x256xf32, #tpu.memory_space<vmem>>, vector<32x128xf32>
    %cst_104 = arith.constant dense<0.000000e+00> : vector<2x128xf32>
    %368 = tpu.matmul %366, %367, %cst_104 {dimension_numbers = #tpu.dot_dimension_numbers<[1], [0], [0], [1], [0, 0, 1, 1], [], []>} : vector<2x32xf32>, vector<32x128xf32>, vector<2x128xf32> -> vector<2x128xf32>
    %369 = vector.extract_strided_slice %277 {offsets = [6, 0], sizes = [2, 128], strides = [1, 1]} : vector<16x256xf32> to vector<2x128xf32>
    %370 = arith.addf %368, %369 : vector<2x128xf32>
    %371 = vector.extract_strided_slice %370 {offsets = [0, 0], sizes = [2, 32], strides = [1, 1]} : vector<2x128xf32> to vector<2x32xf32>
    %372 = arith.negf %371 : vector<2x32xf32>
    %373 = math.exp %372 : vector<2x32xf32>
    %cst_105 = arith.constant 1.000000e+00 : f32
    %374 = vector.broadcast %cst_105 : f32 to vector<2x32xf32>
    %375 = arith.addf %374, %373 : vector<2x32xf32>
    %376 = arith.divf %374, %375 : vector<2x32xf32>
    %377 = vector.extract_strided_slice %370 {offsets = [0, 32], sizes = [2, 32], strides = [1, 1]} : vector<2x128xf32> to vector<2x32xf32>
    %378 = arith.negf %377 : vector<2x32xf32>
    %379 = math.exp %378 : vector<2x32xf32>
    %cst_106 = arith.constant 1.000000e+00 : f32
    %380 = vector.broadcast %cst_106 : f32 to vector<2x32xf32>
    %381 = arith.addf %380, %379 : vector<2x32xf32>
    %382 = arith.divf %380, %381 : vector<2x32xf32>
    %383 = vector.extract_strided_slice %370 {offsets = [0, 64], sizes = [2, 32], strides = [1, 1]} : vector<2x128xf32> to vector<2x32xf32>
    %384 = math.tanh %383 : vector<2x32xf32>
    %385 = vector.extract_strided_slice %370 {offsets = [0, 96], sizes = [2, 32], strides = [1, 1]} : vector<2x128xf32> to vector<2x32xf32>
    %386 = arith.negf %385 : vector<2x32xf32>
    %387 = math.exp %386 : vector<2x32xf32>
    %cst_107 = arith.constant 1.000000e+00 : f32
    %388 = vector.broadcast %cst_107 : f32 to vector<2x32xf32>
    %389 = arith.addf %388, %387 : vector<2x32xf32>
    %390 = arith.divf %388, %389 : vector<2x32xf32>
    %391 = arith.mulf %382, %364 : vector<2x32xf32>
    %392 = arith.mulf %376, %384 : vector<2x32xf32>
    %393 = arith.addf %391, %392 : vector<2x32xf32>
    %394 = math.tanh %393 : vector<2x32xf32>
    %395 = arith.mulf %390, %394 : vector<2x32xf32>
    %c144_108 = arith.constant 144 : index
    %c0_109 = arith.constant 0 : index
    %396 = vector.load %arg1[%c144_108, %c0_109] : memref<240x256xf32, #tpu.memory_space<vmem>>, vector<32x128xf32>
    %cst_110 = arith.constant dense<0.000000e+00> : vector<2x128xf32>
    %397 = tpu.matmul %395, %396, %cst_110 {dimension_numbers = #tpu.dot_dimension_numbers<[1], [0], [0], [1], [0, 0, 1, 1], [], []>} : vector<2x32xf32>, vector<32x128xf32>, vector<2x128xf32> -> vector<2x128xf32>
    %398 = vector.extract_strided_slice %277 {offsets = [8, 0], sizes = [2, 128], strides = [1, 1]} : vector<16x256xf32> to vector<2x128xf32>
    %399 = arith.addf %397, %398 : vector<2x128xf32>
    %400 = vector.extract_strided_slice %399 {offsets = [0, 0], sizes = [2, 32], strides = [1, 1]} : vector<2x128xf32> to vector<2x32xf32>
    %401 = arith.negf %400 : vector<2x32xf32>
    %402 = math.exp %401 : vector<2x32xf32>
    %cst_111 = arith.constant 1.000000e+00 : f32
    %403 = vector.broadcast %cst_111 : f32 to vector<2x32xf32>
    %404 = arith.addf %403, %402 : vector<2x32xf32>
    %405 = arith.divf %403, %404 : vector<2x32xf32>
    %406 = vector.extract_strided_slice %399 {offsets = [0, 32], sizes = [2, 32], strides = [1, 1]} : vector<2x128xf32> to vector<2x32xf32>
    %407 = arith.negf %406 : vector<2x32xf32>
    %408 = math.exp %407 : vector<2x32xf32>
    %cst_112 = arith.constant 1.000000e+00 : f32
    %409 = vector.broadcast %cst_112 : f32 to vector<2x32xf32>
    %410 = arith.addf %409, %408 : vector<2x32xf32>
    %411 = arith.divf %409, %410 : vector<2x32xf32>
    %412 = vector.extract_strided_slice %399 {offsets = [0, 64], sizes = [2, 32], strides = [1, 1]} : vector<2x128xf32> to vector<2x32xf32>
    %413 = math.tanh %412 : vector<2x32xf32>
    %414 = vector.extract_strided_slice %399 {offsets = [0, 96], sizes = [2, 32], strides = [1, 1]} : vector<2x128xf32> to vector<2x32xf32>
    %415 = arith.negf %414 : vector<2x32xf32>
    %416 = math.exp %415 : vector<2x32xf32>
    %cst_113 = arith.constant 1.000000e+00 : f32
    %417 = vector.broadcast %cst_113 : f32 to vector<2x32xf32>
    %418 = arith.addf %417, %416 : vector<2x32xf32>
    %419 = arith.divf %417, %418 : vector<2x32xf32>
    %420 = arith.mulf %411, %393 : vector<2x32xf32>
    %421 = arith.mulf %405, %413 : vector<2x32xf32>
    %422 = arith.addf %420, %421 : vector<2x32xf32>
    %423 = math.tanh %422 : vector<2x32xf32>
    %424 = arith.mulf %419, %423 : vector<2x32xf32>
    %c144_114 = arith.constant 144 : index
    %c0_115 = arith.constant 0 : index
    %425 = vector.load %arg1[%c144_114, %c0_115] : memref<240x256xf32, #tpu.memory_space<vmem>>, vector<32x128xf32>
    %cst_116 = arith.constant dense<0.000000e+00> : vector<2x128xf32>
    %426 = tpu.matmul %424, %425, %cst_116 {dimension_numbers = #tpu.dot_dimension_numbers<[1], [0], [0], [1], [0, 0, 1, 1], [], []>} : vector<2x32xf32>, vector<32x128xf32>, vector<2x128xf32> -> vector<2x128xf32>
    %427 = vector.extract_strided_slice %277 {offsets = [10, 0], sizes = [2, 128], strides = [1, 1]} : vector<16x256xf32> to vector<2x128xf32>
    %428 = arith.addf %426, %427 : vector<2x128xf32>
    %429 = vector.extract_strided_slice %428 {offsets = [0, 0], sizes = [2, 32], strides = [1, 1]} : vector<2x128xf32> to vector<2x32xf32>
    %430 = arith.negf %429 : vector<2x32xf32>
    %431 = math.exp %430 : vector<2x32xf32>
    %cst_117 = arith.constant 1.000000e+00 : f32
    %432 = vector.broadcast %cst_117 : f32 to vector<2x32xf32>
    %433 = arith.addf %432, %431 : vector<2x32xf32>
    %434 = arith.divf %432, %433 : vector<2x32xf32>
    %435 = vector.extract_strided_slice %428 {offsets = [0, 32], sizes = [2, 32], strides = [1, 1]} : vector<2x128xf32> to vector<2x32xf32>
    %436 = arith.negf %435 : vector<2x32xf32>
    %437 = math.exp %436 : vector<2x32xf32>
    %cst_118 = arith.constant 1.000000e+00 : f32
    %438 = vector.broadcast %cst_118 : f32 to vector<2x32xf32>
    %439 = arith.addf %438, %437 : vector<2x32xf32>
    %440 = arith.divf %438, %439 : vector<2x32xf32>
    %441 = vector.extract_strided_slice %428 {offsets = [0, 64], sizes = [2, 32], strides = [1, 1]} : vector<2x128xf32> to vector<2x32xf32>
    %442 = math.tanh %441 : vector<2x32xf32>
    %443 = vector.extract_strided_slice %428 {offsets = [0, 96], sizes = [2, 32], strides = [1, 1]} : vector<2x128xf32> to vector<2x32xf32>
    %444 = arith.negf %443 : vector<2x32xf32>
    %445 = math.exp %444 : vector<2x32xf32>
    %cst_119 = arith.constant 1.000000e+00 : f32
    %446 = vector.broadcast %cst_119 : f32 to vector<2x32xf32>
    %447 = arith.addf %446, %445 : vector<2x32xf32>
    %448 = arith.divf %446, %447 : vector<2x32xf32>
    %449 = arith.mulf %440, %422 : vector<2x32xf32>
    %450 = arith.mulf %434, %442 : vector<2x32xf32>
    %451 = arith.addf %449, %450 : vector<2x32xf32>
    %452 = math.tanh %451 : vector<2x32xf32>
    %453 = arith.mulf %448, %452 : vector<2x32xf32>
    %c144_120 = arith.constant 144 : index
    %c0_121 = arith.constant 0 : index
    %454 = vector.load %arg1[%c144_120, %c0_121] : memref<240x256xf32, #tpu.memory_space<vmem>>, vector<32x128xf32>
    %cst_122 = arith.constant dense<0.000000e+00> : vector<2x128xf32>
    %455 = tpu.matmul %453, %454, %cst_122 {dimension_numbers = #tpu.dot_dimension_numbers<[1], [0], [0], [1], [0, 0, 1, 1], [], []>} : vector<2x32xf32>, vector<32x128xf32>, vector<2x128xf32> -> vector<2x128xf32>
    %456 = vector.extract_strided_slice %277 {offsets = [12, 0], sizes = [2, 128], strides = [1, 1]} : vector<16x256xf32> to vector<2x128xf32>
    %457 = arith.addf %455, %456 : vector<2x128xf32>
    %458 = vector.extract_strided_slice %457 {offsets = [0, 0], sizes = [2, 32], strides = [1, 1]} : vector<2x128xf32> to vector<2x32xf32>
    %459 = arith.negf %458 : vector<2x32xf32>
    %460 = math.exp %459 : vector<2x32xf32>
    %cst_123 = arith.constant 1.000000e+00 : f32
    %461 = vector.broadcast %cst_123 : f32 to vector<2x32xf32>
    %462 = arith.addf %461, %460 : vector<2x32xf32>
    %463 = arith.divf %461, %462 : vector<2x32xf32>
    %464 = vector.extract_strided_slice %457 {offsets = [0, 32], sizes = [2, 32], strides = [1, 1]} : vector<2x128xf32> to vector<2x32xf32>
    %465 = arith.negf %464 : vector<2x32xf32>
    %466 = math.exp %465 : vector<2x32xf32>
    %cst_124 = arith.constant 1.000000e+00 : f32
    %467 = vector.broadcast %cst_124 : f32 to vector<2x32xf32>
    %468 = arith.addf %467, %466 : vector<2x32xf32>
    %469 = arith.divf %467, %468 : vector<2x32xf32>
    %470 = vector.extract_strided_slice %457 {offsets = [0, 64], sizes = [2, 32], strides = [1, 1]} : vector<2x128xf32> to vector<2x32xf32>
    %471 = math.tanh %470 : vector<2x32xf32>
    %472 = vector.extract_strided_slice %457 {offsets = [0, 96], sizes = [2, 32], strides = [1, 1]} : vector<2x128xf32> to vector<2x32xf32>
    %473 = arith.negf %472 : vector<2x32xf32>
    %474 = math.exp %473 : vector<2x32xf32>
    %cst_125 = arith.constant 1.000000e+00 : f32
    %475 = vector.broadcast %cst_125 : f32 to vector<2x32xf32>
    %476 = arith.addf %475, %474 : vector<2x32xf32>
    %477 = arith.divf %475, %476 : vector<2x32xf32>
    %478 = arith.mulf %469, %451 : vector<2x32xf32>
    %479 = arith.mulf %463, %471 : vector<2x32xf32>
    %480 = arith.addf %478, %479 : vector<2x32xf32>
    %481 = math.tanh %480 : vector<2x32xf32>
    %482 = arith.mulf %477, %481 : vector<2x32xf32>
    %c144_126 = arith.constant 144 : index
    %c0_127 = arith.constant 0 : index
    %483 = vector.load %arg1[%c144_126, %c0_127] : memref<240x256xf32, #tpu.memory_space<vmem>>, vector<32x128xf32>
    %cst_128 = arith.constant dense<0.000000e+00> : vector<2x128xf32>
    %484 = tpu.matmul %482, %483, %cst_128 {dimension_numbers = #tpu.dot_dimension_numbers<[1], [0], [0], [1], [0, 0, 1, 1], [], []>} : vector<2x32xf32>, vector<32x128xf32>, vector<2x128xf32> -> vector<2x128xf32>
    %485 = vector.extract_strided_slice %277 {offsets = [14, 0], sizes = [2, 128], strides = [1, 1]} : vector<16x256xf32> to vector<2x128xf32>
    %486 = arith.addf %484, %485 : vector<2x128xf32>
    %487 = vector.extract_strided_slice %486 {offsets = [0, 0], sizes = [2, 32], strides = [1, 1]} : vector<2x128xf32> to vector<2x32xf32>
    %488 = arith.negf %487 : vector<2x32xf32>
    %489 = math.exp %488 : vector<2x32xf32>
    %cst_129 = arith.constant 1.000000e+00 : f32
    %490 = vector.broadcast %cst_129 : f32 to vector<2x32xf32>
    %491 = arith.addf %490, %489 : vector<2x32xf32>
    %492 = arith.divf %490, %491 : vector<2x32xf32>
    %493 = vector.extract_strided_slice %486 {offsets = [0, 32], sizes = [2, 32], strides = [1, 1]} : vector<2x128xf32> to vector<2x32xf32>
    %494 = arith.negf %493 : vector<2x32xf32>
    %495 = math.exp %494 : vector<2x32xf32>
    %cst_130 = arith.constant 1.000000e+00 : f32
    %496 = vector.broadcast %cst_130 : f32 to vector<2x32xf32>
    %497 = arith.addf %496, %495 : vector<2x32xf32>
    %498 = arith.divf %496, %497 : vector<2x32xf32>
    %499 = vector.extract_strided_slice %486 {offsets = [0, 64], sizes = [2, 32], strides = [1, 1]} : vector<2x128xf32> to vector<2x32xf32>
    %500 = math.tanh %499 : vector<2x32xf32>
    %501 = vector.extract_strided_slice %486 {offsets = [0, 96], sizes = [2, 32], strides = [1, 1]} : vector<2x128xf32> to vector<2x32xf32>
    %502 = arith.negf %501 : vector<2x32xf32>
    %503 = math.exp %502 : vector<2x32xf32>
    %cst_131 = arith.constant 1.000000e+00 : f32
    %504 = vector.broadcast %cst_131 : f32 to vector<2x32xf32>
    %505 = arith.addf %504, %503 : vector<2x32xf32>
    %506 = arith.divf %504, %505 : vector<2x32xf32>
    %507 = arith.mulf %498, %480 : vector<2x32xf32>
    %508 = arith.mulf %492, %500 : vector<2x32xf32>
    %509 = arith.addf %507, %508 : vector<2x32xf32>
    %510 = math.tanh %509 : vector<2x32xf32>
    %511 = arith.mulf %506, %510 : vector<2x32xf32>
    %512 = vector.extract_strided_slice %277 {offsets = [14, 128], sizes = [2, 128], strides = [1, 1]} : vector<16x256xf32> to vector<2x128xf32>
    %cst_132 = arith.constant 0.000000e+00 : f32
    %513 = vector.broadcast %cst_132 : f32 to vector<2x32xf32>
    %514 = vector.extract_strided_slice %512 {offsets = [0, 0], sizes = [2, 32], strides = [1, 1]} : vector<2x128xf32> to vector<2x32xf32>
    %515 = arith.negf %514 : vector<2x32xf32>
    %516 = math.exp %515 : vector<2x32xf32>
    %cst_133 = arith.constant 1.000000e+00 : f32
    %517 = vector.broadcast %cst_133 : f32 to vector<2x32xf32>
    %518 = arith.addf %517, %516 : vector<2x32xf32>
    %519 = arith.divf %517, %518 : vector<2x32xf32>
    %520 = vector.extract_strided_slice %512 {offsets = [0, 32], sizes = [2, 32], strides = [1, 1]} : vector<2x128xf32> to vector<2x32xf32>
    %521 = arith.negf %520 : vector<2x32xf32>
    %522 = math.exp %521 : vector<2x32xf32>
    %cst_134 = arith.constant 1.000000e+00 : f32
    %523 = vector.broadcast %cst_134 : f32 to vector<2x32xf32>
    %524 = arith.addf %523, %522 : vector<2x32xf32>
    %525 = arith.divf %523, %524 : vector<2x32xf32>
    %526 = vector.extract_strided_slice %512 {offsets = [0, 64], sizes = [2, 32], strides = [1, 1]} : vector<2x128xf32> to vector<2x32xf32>
    %527 = math.tanh %526 : vector<2x32xf32>
    %528 = vector.extract_strided_slice %512 {offsets = [0, 96], sizes = [2, 32], strides = [1, 1]} : vector<2x128xf32> to vector<2x32xf32>
    %529 = arith.negf %528 : vector<2x32xf32>
    %530 = math.exp %529 : vector<2x32xf32>
    %cst_135 = arith.constant 1.000000e+00 : f32
    %531 = vector.broadcast %cst_135 : f32 to vector<2x32xf32>
    %532 = arith.addf %531, %530 : vector<2x32xf32>
    %533 = arith.divf %531, %532 : vector<2x32xf32>
    %534 = arith.mulf %525, %513 : vector<2x32xf32>
    %535 = arith.mulf %519, %527 : vector<2x32xf32>
    %536 = arith.addf %534, %535 : vector<2x32xf32>
    %537 = math.tanh %536 : vector<2x32xf32>
    %538 = arith.mulf %533, %537 : vector<2x32xf32>
    %539 = tpu.concatenate %511, %538 in 1 : vector<2x32xf32>, vector<2x32xf32> -> vector<2x64xf32>
    %c176 = arith.constant 176 : index
    %c0_136 = arith.constant 0 : index
    %540 = vector.load %arg1[%c176, %c0_136] : memref<240x256xf32, #tpu.memory_space<vmem>>, vector<64x256xf32>
    %cst_137 = arith.constant dense<0.000000e+00> : vector<2x256xf32>
    %541 = tpu.matmul %539, %540, %cst_137 {dimension_numbers = #tpu.dot_dimension_numbers<[1], [0], [0], [1], [0, 0, 1, 1], [], []>} : vector<2x64xf32>, vector<64x256xf32>, vector<2x256xf32> -> vector<2x256xf32>
    %c2_138 = arith.constant 2 : index
    %c0_139 = arith.constant 0 : index
    %542 = vector.load %arg2[%c2_138, %c0_139] : memref<3x256xf32, #tpu.memory_space<vmem>>, vector<1x256xf32>
    %543 = vector.broadcast %542 : vector<1x256xf32> to vector<2x256xf32>
    %544 = arith.addf %541, %543 : vector<2x256xf32>
    %545 = vector.extract_strided_slice %544 {offsets = [0, 0], sizes = [2, 3], strides = [1, 1]} : vector<2x256xf32> to vector<2x3xf32>
    %c0_140 = arith.constant 0 : index
    %c0_141 = arith.constant 0 : index
    %546 = vector.load %arg3[%c0_140, %c0_141] : memref<2x3xf32, #tpu.memory_space<vmem>>, vector<2x3xf32>
    tpu.vector_store %arg3[%c0_140, %c0_141], %545 {strides = array<i32>} : memref<2x3xf32, #tpu.memory_space<vmem>>, vector<2x3xf32>,
    return
  }
}

</mosaic_0001>

<bundles_post_ra>
// kernel: tpu_custom_call.1
= control target key start
LH: loop header
LB: loop body
LE: loop exit
PB: predicated region body
PF: predicated region fallthrough
CT: control target
= control target key end

     0   :  { %8 = vsyncpa [#allocation4], 0  ;;  %s3239_s0 = inlined_call_operand.hbm [shape: f32[16,16], index: 0, kind: input, shape index: {}]   ;;  %s3240_s1 = inlined_call_operand.hbm [shape: f32[240,256], index: 1, kind: input, shape index: {}]   ;;  %s3241_s2 = inlined_call_operand.hbm [shape: f32[3,256], index: 2, kind: input, shape index: {}]   ;;  %s3242_s3 = inlined_call_operand.hbm [shape: f32[2,3], index: 3, kind: output, shape index: {}]  }
   0x1   :  { %9 = vsyncpa [#allocation7], 0 }
   0x2   :  { %10 = vsyncpa [#allocation5], 0  ;;  %s2853_s12 = smov [#allocation6]   ;;  %s2759_s16 = scalar_lea.hbm %s3240_s1, 7680 }
   0x3   :  { %s28_s13 = sshll.u32 %s2853_s12, 4  ;;  %p2760_p0 = scmp.ne.s32.totalorder %s3240_s1, %s2759_s16  ;;  %s29_s13 = int_to_ptr.vmem [resolvable:$true] %s28_s13 }
   0x4   :  { %p2763_p1 = scmp.lt.u32.totalorder %s2759_s16, %s3240_s1 }
   0x6   :  { %p2765_p2 = pnand %p2763_p1, %p2760_p0 }
   0x8   :  { %2768 = shalt.err (!%p2765_p2)
}
   0x9   :  { %s2769_s21 = scalar_lea.vmem %s29_s13, 7680  ;;  %p2774_p4 = scmp.lt.s32.totalorder %s29_s13, %s29_s13 }
   0xa   :  { %p2770_p3 = scmp.ne.s32.totalorder %s29_s13, %s2769_s21  ;;  %p2775_p5 = scmp.lt.s32.totalorder %s2769_s21, %s2769_s21 }
   0xc   :  { %p2776_p6 = por %p2775_p5, %p2774_p4 }
   0xe   :  { %p2777_p7 = pnand %p2776_p6, %p2770_p3 }
  0x10   :  { %2780 = shalt.err (!%p2777_p7)
}
  0x11   :  { %s2854_s22 = smov 256   ;;  %s2855_s23 = smov 16  }
  0x12   :  { %34 = dma.hbm_to_vmem [thread:$0]  %s3240_s1, 7680, %s29_s13, [#allocation7], %s2854_s22, %s2854_s22, %s2855_s23  }
  0x13   :  { %s2856_s26 = smov [#allocation3]   ;;  %s2781_s30 = scalar_lea.hbm %s3239_s0, 256 }
  0x14   :  { %s16_s27 = sshll.u32 %s2856_s26, 4  ;;  %p2782_p8 = scmp.ne.s32.totalorder %s3239_s0, %s2781_s30  ;;  %s17_s27 = int_to_ptr.vmem [resolvable:$true] %s16_s27 }
  0x15   :  { %p2785_p9 = scmp.lt.u32.totalorder %s2781_s30, %s3239_s0 }
  0x17   :  { %p2787_p10 = pnand %p2785_p9, %p2782_p8 }
  0x19   :  { %2790 = shalt.err (!%p2787_p10)
}
  0x1a   :  { %s2791_s8 = scalar_lea.vmem %s17_s27, 256  ;;  %p2796_p12 = scmp.lt.s32.totalorder %s17_s27, %s17_s27 }
  0x1b   :  { %p2792_p11 = scmp.ne.s32.totalorder %s17_s27, %s2791_s8  ;;  %p2797_p13 = scmp.lt.s32.totalorder %s2791_s8, %s2791_s8 }
  0x1d   :  { %p2798_p0 = por %p2797_p13, %p2796_p12 }
  0x1f   :  { %p2799_p1 = pnand %p2798_p0, %p2792_p11 }
  0x21   :  { %2802 = shalt.err (!%p2799_p1)
}
  0x22   :  { %s2857_s1 = smov 128   ;;  %s2858_s9 = smov 8  }
  0x23   :  { %22 = dma.hbm_to_vmem [thread:$0]  %s3239_s0, 256, %s17_s27, [#allocation4], %s2857_s1, %s2857_s1, %s2858_s9  }
  0x24   :  { %s2859_s12 = smov [#allocation8]   ;;  %s2803_s16 = scalar_lea.hbm %s3241_s2, 128 }
  0x25   :  { %s41_s13 = sshll.u32 %s2859_s12, 4  ;;  %p2804_p2 = scmp.ne.s32.totalorder %s3241_s2, %s2803_s16  ;;  %s42_s13 = int_to_ptr.vmem [resolvable:$true] %s41_s13 }
  0x26   :  { %p2807_p3 = scmp.lt.u32.totalorder %s2803_s16, %s3241_s2 }
  0x28   :  { %p2809_p4 = pnand %p2807_p3, %p2804_p2 }
  0x2a   :  { %2812 = shalt.err (!%p2809_p4)
}
  0x2b   :  { %s2813_s21 = scalar_lea.vmem %s42_s13, 128  ;;  %p2818_p6 = scmp.lt.s32.totalorder %s42_s13, %s42_s13 }
  0x2c   :  { %p2814_p5 = scmp.ne.s32.totalorder %s42_s13, %s2813_s21  ;;  %p2819_p7 = scmp.lt.s32.totalorder %s2813_s21, %s2813_s21 }
  0x2e   :  { %p2820_p8 = por %p2819_p7, %p2818_p6 }
  0x30   :  { %p2821_p9 = pnand %p2820_p8, %p2814_p5 }
  0x32   :  { %2824 = shalt.err (!%p2821_p9)
}
  0x33   :  { %44 = dma.hbm_to_vmem [thread:$0]  %s3241_s2, 128, %s42_s13, [#allocation7]  }
  0x34   :  { %2847 = dma.done.wait [#allocation4], 256  }
  0x35   :  { %2848 = vsyncadd [#allocation4], 4294967040 }
  0x36   :  { %2849 = dma.done.wait [#allocation7], 7808  }
  0x37   :  { %2850 = vsyncadd [#allocation7], 4294959488  ;;  %v2860_v0 = vmov 0.0   ;;  %v157_v1 = vld [vmem:[#allocation6 + $0x28] sm:$0xff]  ;;  %v159_v2 = vld [vmem:[#allocation6 + $0x38] sm:$0xff]  ;;  %vm72_vm0 = vcmask 130048   ;;  %v62_v32 = vlaneseq }
  0x38   :  { %143 = vmatprep.mubr.f32.mxu0 %v2860_v0  ;;  %240 = vmatprep.mubr.f32.mxu1 %v2860_v0  ;;  %v156_v3 = vld [vmem:[#allocation6 + $0x20] sm:$0xff]  ;;  %v2924_v4 = vpack.c.bf16 %v159_v2, %v157_v1  ;;  %v158_v5 = vld [vmem:[#allocation6 + $0x30] sm:$0xff]  ;;  %v161_v6 = vld [vmem:[#allocation6 + $0x48] sm:$0xff]  ;;  %s2861_s2 = smov 64   ;;  %vm273_vm1 = vcmask 254976   ;;  %vm275_vm2 = vcmask 517376  }
  0x39   :  { %v163_v7 = vld [vmem:[#allocation6 + $0x58] sm:$0xff]  ;;  %v2926_v8 = vpack.c.bf16 %v158_v5, %v156_v3  ;;  %v160_v10 = vld [vmem:[#allocation6 + $0x40] sm:$0xff]  ;;  %v162_v11 = vld [vmem:[#allocation6 + $0x50] sm:$0xff]  ;;  %v2970_v33 = vshrl.u32 %v62_v32, 7  ;;  %vm172_vm3 = vcmask 523264   ;;  %vm2863_vm4 = vmmov 0  }
  0x3a   :  { %v2928_v9 = vpack.c.bf16 %v163_v7, %v161_v6  ;;  %v165_v12 = vld [vmem:[#allocation6 + $0x68] sm:$0xff]  ;;  %2371 = vmatprep.subr.bf16.mxu1 %v2924_v4  ;;  %v167_v13 = vld [vmem:[#allocation6 + $0x78] sm:$0xff]  ;;  %v2932_v16 = vpack.c.bf16 %v162_v11, %v160_v10  ;;  %v56_v18 = vld [vmem:[#allocation6] sm:$0xff]  ;;  %s2864_s23 = smov 32   ;;  %vm1241_vm5 = vcmask 261120   ;;  %s2865_s24 = smov [#allocation9]  }
  0x3b   :  { %v57_v14 = vld [vmem:[#allocation6 + $0x8] sm:$0xff]  ;;  %v59_v15 = vld [vmem:[#allocation6 + $0x18] sm:$0xff]  ;;  %2373 = vmatpush1.bf16.msra.mxu1 %v2926_v8  ;;  %v2935_v19 = vpack.c.bf16 %v167_v13, %v165_v12  ;;  %v164_v20 = vld [vmem:[#allocation6 + $0x60] sm:$0xff]  ;;  %v2973_v34 = vsub.s32 0, %v2970_v33  ;;  %v68_v36 = vsub.s32 1, %v2970_v33  ;;  %s2184_s25 = sshll.u32 %s2865_s24, 4  ;;  %s2185_s25 = int_to_ptr.vmem [resolvable:$true] %s2184_s25 }
  0x3c   :  { %v2366_v17 = vpack.c.bf16 %v59_v15, %v57_v14  ;;  %2375 = vmatprep.subr.bf16.mxu1 %v2928_v9  ;;  %v166_v21 = vld [vmem:[#allocation6 + $0x70] sm:$0xff]  ;;  %v169_v24 = vld [vmem:[#allocation6 + $0x88] sm:$0xff]  ;;  %v171_v25 = vld [vmem:[#allocation6 + $0x98] sm:$0xff]  ;;  %vm2176_vm6 = vcmask 17408   ;;  %s2825_s26 = scalar_lea.vmem %s2185_s25, 32  ;;  %p2830_p11 = scmp.lt.s32.totalorder %s2185_s25, %s2185_s25 }
  0x3d   :  { %v58_v22 = vld [vmem:[#allocation6 + $0x10] sm:$0xff]  ;;  %v2938_v26 = vpack.c.bf16 %v166_v21, %v164_v20  ;;  %v2941_v28 = vpack.c.bf16 %v171_v25, %v169_v24  ;;  %v168_v29 = vld [vmem:[#allocation6 + $0x80] sm:$0xff]  ;;  %v55_v53 = vld [vmem:[#allocation3 + $0x8] sm:$0xff]  ;;  %p2826_p10 = scmp.ne.s32.totalorder %s2185_s25, %s2825_s26  ;;  %p2831_p12 = scmp.lt.s32.totalorder %s2825_s26, %s2825_s26 }
  0x3e   :  { %2367 = vmatprep.subr.bf16.mxu0 %v2366_v17  ;;  %v2368_v23 = vpack.c.bf16 %v58_v22, %v56_v18  ;;  %v54_v27 = vld [vmem:[#allocation3] sm:$0xff]  ;;  %v60_v35 = vld [vmem:[#allocation8] ss:$4 sm:$0x3] }
  0x3f   :  { %2377 = vmatpush1.bf16.msra.mxu1 %v2932_v16  ;;  %v170_v30 = vld [vmem:[#allocation6 + $0x90] sm:$0xff]  ;;  %v2977_v38 = vrot.slane %v60_v35, %v2973_v34  ;;  %v2981_v40 = vrot.slane %v60_v35, %v68_v36  ;;  %p2832_p13 = por %p2831_p12, %p2830_p11 }
  0x40   :  { %2369 = vmatpush1.bf16.msra.mxu0 %v2368_v23  ;;  %2379 = vmatprep.subr.bf16.mxu1 %v2935_v19  ;;  %v2946_v31 = vpack.c.bf16 %v170_v30, %v168_v29 }
  0x41   :  { %2387 = vmatprep.subr.bf16.mxu0 %v2924_v4  ;;  %p2833_p0 = pnand %p2832_p13, %p2826_p10 }
  0x43   :  { %2194 = vmatmul.mubr.msk.f32.vlgmr.msra.gmra.mrb[0].mxu0 %vm72_vm0, %v54_v27  ;;  %2381 = vmatpush1.bf16.msra.mxu1 %v2938_v26 }
  0x44   :  { %2389 = vmatpush1.bf16.msra.mxu0 %v2926_v8  ;;  %2383 = vmatprep.subr.bf16.mxu1 %v2941_v28 }
  0x45   :  { %2391 = vmatprep.subr.bf16.mxu0 %v2928_v9  ;;  %149 = vmatprep.mubr.f32.mxu0 %v2860_v0 }
  0x47   :  { %2385 = vmatpush1.bf16.msra.mxu1 %v2946_v31  ;;  %2195 = vmatmul.mubr.msk.f32.gmra.mrb[2].mxu0 %vm72_vm0, %v55_v53 }
  0x48   :  { %2393 = vmatpush1.bf16.msra.mxu0 %v2932_v16  ;;  %2403 = vmatprep.subr.bf16.mxu1 %v2924_v4 }
  0x49   :  { %2395 = vmatprep.subr.bf16.mxu0 %v2935_v19  ;;  %365 = vmatprep.mubr.f32.mxu0 %v2860_v0 }
  0x4a   :  { %241 = vmatmul.mubr.f32.vlgmr.msra.gmra.mrb[0].mxu1 %v2860_v0 }
  0x4b   :  { %2405 = vmatpush1.bf16.msra.mxu1 %v2926_v8  ;;  %486 = vmatprep.mubr.f32.mxu1 %v2860_v0 }
  0x4c   :  { %2397 = vmatpush1.bf16.msra.mxu0 %v2938_v26  ;;  %2407 = vmatprep.subr.bf16.mxu1 %v2928_v9 }
  0x4d   :  { %2399 = vmatprep.subr.bf16.mxu0 %v2941_v28 }
  0x4f   :  { %2409 = vmatpush1.bf16.msra.mxu1 %v2932_v16 }
  0x50   :  { %2401 = vmatpush1.bf16.msra.mxu0 %v2946_v31  ;;  %2411 = vmatprep.subr.bf16.mxu1 %v2935_v19 }
  0x51   :  { %2419 = vmatprep.subr.bf16.mxu0 %v2924_v4 }
  0x53   :  { %2413 = vmatpush1.bf16.msra.mxu1 %v2938_v26 }
  0x54   :  { %2415 = vmatprep.subr.bf16.mxu1 %v2941_v28 }
  0x57   :  { %2417 = vmatpush1.bf16.msra.mxu1 %v2946_v31 }
  0x58   :  { %2435 = vmatprep.subr.bf16.mxu1 %v2924_v4 }
 0x116   :  { %v145_v37 = vpop.f32.mrb[0].mxu0 }
 0x117   :  { %v147_v39 = vpop.f32.mrb[1].mxu0  ;;  %v2984_v41 = vadd.f32 %v145_v37, %v2977_v38 }
 0x118   :  { %v2987_v42 = vadd.f32 %v147_v39, %v2981_v40 }
 0x119   :  { %v295_v3 = vrot.slane %v2984_v41, 2  ;;  %v416_v35 = vrot.slane %v2984_v41, 4 }
 0x11a   :  { %v2995_v63 = vpop.f32.mrb[2].mxu0  ;;  %v296_v6 = vrot.slane %v2987_v42, 2  ;;  %v417_v39 = vrot.slane %v2987_v42, 4 }
 0x11b   :  { %v2997_v1 = vpop.f32.mrb[3].mxu0 }
 0x11d   :  { %v242_v43 = vpop.f32.mrb[0].mxu1 }
 0x11e   :  { %v243_v44 = vadd.f32 %v242_v43, %v2984_v41  ;;  %v244_v45 = vpop.f32.mrb[1].mxu1 }
 0x11f   :  { %v245_v46 = vadd.f32 %v244_v45, %v2987_v42 }
 0x120   :  { %v2196_v47 = vmul.f32 -1.442695, %v243_v44 }
 0x121   :  { %v2197_v54 = vmul.f32 -1.442695, %v245_v46 }
 0x122   :  { %2591 = vpow2.f32 %v2196_v47 }
 0x123   :  { %2593 = vtanh.f32 %v245_v46 }
 0x12c   :  { %v2592_v48 = vpop.eup %2591 }
 0x12d   :  { %v250_v49 = vadd.f32 1.0, %v2592_v48  ;;  %v2594_v50 = vpop.eup %2593 }
 0x12f   :  { %2595 = vrcp.f32 %v250_v49 }
 0x130   :  { %2597 = vpow2.f32 %v2197_v54 }
 0x139   :  { %v2596_v51 = vpop.eup %2595 }
 0x13a   :  { %v261_v52 = vmul.f32 %v2596_v51, %v2594_v50  ;;  %v2598_v55 = vpop.eup %2597  ;;  %v260_v57 = vmul.f32 0.0, %v2596_v51 }
 0x13b   :  { %v257_v56 = vadd.f32 1.0, %v2598_v55 }
 0x13c   :  { %263 = vrot.lane.b32.xlu0 %v261_v52, %s2861_s2 }
 0x13d   :  { %2599 = vrcp.f32 %v257_v56 }
 0x147   :  { %v2600_v60 = vpop.eup %2599 }
 0x1ae   :  { %v264_v58 = vpop.permute.xlu0 %263 }
 0x1af   :  { %v266_v59 = vadd.f32 %v264_v58, %v260_v57 }
 0x1b1   :  { %2601 = vtanh.f32 %v266_v59 }
 0x1bb   :  { %v2602_v61 = vpop.eup %2601 }
 0x1bc   :  { %v268_v62 = vmul.f32 %v2602_v61, %v2600_v60 }
 0x1be   :  { %270 = vrot.lane.b32.xlu0 %v268_v62, %s2861_s2  ;;  %v537_v62 = vrot.slane %v2984_v41, 6 }
 0x230   :  { %v271_v2 = vpop.permute.xlu0 %270 }
 0x231   :  { %274 = vst.msk [vmem:[#allocation2] sm:$0x3] %vm273_vm1, %v271_v2  ;;  %2198 = vmatmul.mubr.msk.f32.vlgmr.msra.gmra.mrb[4].mxu0 %vm172_vm3, %v271_v2 }
 0x232   :  { %276 = vst.msk [vmem:[#allocation2 + $0xe] sm:$0x3] %vm275_vm2, %v271_v2  ;;  %2421 = vmatpush1.bf16.msra.mxu0 %v2926_v8  ;;  %607 = vmatprep.mubr.f32.mxu0 %v2860_v0 }
 0x233   :  { %2423 = vmatprep.subr.bf16.mxu0 %v2928_v9 }
 0x236   :  { %2425 = vmatpush1.bf16.msra.mxu0 %v2932_v16 }
 0x237   :  { %2427 = vmatprep.subr.bf16.mxu0 %v2935_v19 }
 0x23a   :  { %2429 = vmatpush1.bf16.msra.mxu0 %v2938_v26 }
 0x23b   :  { %2431 = vmatprep.subr.bf16.mxu0 %v2941_v28 }
 0x23e   :  { %2433 = vmatpush1.bf16.msra.mxu0 %v2946_v31 }
 0x23f   :  { %2451 = vmatprep.subr.bf16.mxu0 %v2924_v4 }
 0x304   :  { %v367_v5 = vpop.f32.mrb[4].mxu0 }
 0x305   :  { %v368_v7 = vadd.f32 %v367_v5, %v295_v3  ;;  %v369_v10 = vpop.f32.mrb[5].mxu0  ;;  %v538_v3 = vrot.slane %v2987_v42, 6 }
 0x306   :  { %v370_v11 = vadd.f32 %v369_v10, %v296_v6 }
 0x307   :  { %v2199_v12 = vmul.f32 -1.442695, %v368_v7 }
 0x308   :  { %v2200_v20 = vmul.f32 -1.442695, %v370_v11 }
 0x309   :  { %2603 = vpow2.f32 %v2199_v12 }
 0x30a   :  { %2605 = vtanh.f32 %v370_v11 }
 0x313   :  { %v2604_v13 = vpop.eup %2603 }
 0x314   :  { %v375_v14 = vadd.f32 1.0, %v2604_v13  ;;  %v2606_v15 = vpop.eup %2605 }
 0x316   :  { %2607 = vrcp.f32 %v375_v14 }
 0x317   :  { %2609 = vpow2.f32 %v2200_v20 }
 0x320   :  { %v2608_v17 = vpop.eup %2607 }
 0x321   :  { %v386_v18 = vmul.f32 %v2608_v17, %v2606_v15  ;;  %v2610_v21 = vpop.eup %2609  ;;  %v385_v23 = vmul.f32 %v2608_v17, %v266_v59 }
 0x322   :  { %v382_v22 = vadd.f32 1.0, %v2610_v21 }
 0x323   :  { %388 = vrot.lane.b32.xlu1 %v386_v18, %s2861_s2 }
 0x324   :  { %2611 = vrcp.f32 %v382_v22 }
 0x32e   :  { %v2612_v27 = vpop.eup %2611 }
 0x395   :  { %v389_v24 = vpop.permute.xlu1 %388 }
 0x396   :  { %v391_v25 = vadd.f32 %v389_v24, %v385_v23 }
 0x398   :  { %2613 = vtanh.f32 %v391_v25 }
 0x3a2   :  { %v2614_v29 = vpop.eup %2613 }
 0x3a3   :  { %v393_v30 = vmul.f32 %v2614_v29, %v2612_v27 }
 0x3a5   :  { %395 = vrot.lane.b32.xlu1 %v393_v30, %s2861_s2 }
 0x417   :  { %v396_v32 = vpop.permute.xlu1 %395 }
 0x418   :  { %398 = vst.msk [vmem:[#allocation2 + $0x2] sm:$0x3] %vm273_vm1, %v396_v32  ;;  %2201 = vmatmul.mubr.msk.f32.vlgmr.msra.gmra.mrb[2].mxu1 %vm172_vm3, %v396_v32 }
 0x419   :  { %399 = vst.msk [vmem:[#allocation2 + $0xc] sm:$0x3] %vm275_vm2, %v396_v32  ;;  %2437 = vmatpush1.bf16.msra.mxu1 %v2926_v8  ;;  %724 = vmatprep.mubr.f32.mxu1 %v2860_v0 }
 0x41a   :  { %2439 = vmatprep.subr.bf16.mxu1 %v2928_v9 }
 0x41d   :  { %2441 = vmatpush1.bf16.msra.mxu1 %v2932_v16 }
 0x41e   :  { %2443 = vmatprep.subr.bf16.mxu1 %v2935_v19 }
 0x421   :  { %2445 = vmatpush1.bf16.msra.mxu1 %v2938_v26 }
 0x422   :  { %2447 = vmatprep.subr.bf16.mxu1 %v2941_v28 }
 0x425   :  { %2449 = vmatpush1.bf16.msra.mxu1 %v2946_v31 }
 0x426   :  { %2467 = vmatprep.subr.bf16.mxu1 %v2924_v4 }
 0x4eb   :  { %v488_v37 = vpop.f32.mrb[2].mxu1 }
 0x4ec   :  { %v489_v43 = vadd.f32 %v488_v37, %v416_v35  ;;  %v490_v44 = vpop.f32.mrb[3].mxu1  ;;  %v3065_v35 = vadd.f32 %v2997_v1, %v2981_v40 }
 0x4ed   :  { %v491_v45 = vadd.f32 %v490_v44, %v417_v39 }
 0x4ee   :  { %v2202_v46 = vmul.f32 -1.442695, %v489_v43 }
 0x4ef   :  { %v2203_v52 = vmul.f32 -1.442695, %v491_v45 }
 0x4f0   :  { %2615 = vpow2.f32 %v2202_v46 }
 0x4f1   :  { %2617 = vtanh.f32 %v491_v45 }
 0x4fa   :  { %v2616_v47 = vpop.eup %2615 }
 0x4fb   :  { %v496_v48 = vadd.f32 1.0, %v2616_v47  ;;  %v2618_v49 = vpop.eup %2617 }
 0x4fd   :  { %2619 = vrcp.f32 %v496_v48 }
 0x4fe   :  { %2621 = vpow2.f32 %v2203_v52 }
 0x507   :  { %v2620_v50 = vpop.eup %2619 }
 0x508   :  { %v507_v51 = vmul.f32 %v2620_v50, %v2618_v49  ;;  %v2622_v53 = vpop.eup %2621  ;;  %v506_v55 = vmul.f32 %v2620_v50, %v391_v25  ;;  %v3060_v25 = vadd.f32 %v2995_v63, %v2977_v38 }
 0x509   :  { %v503_v54 = vadd.f32 1.0, %v2622_v53 }
 0x50a   :  { %509 = vrot.lane.b32.xlu0 %v507_v51, %s2861_s2  ;;  %v777_v53 = vrot.slane %v3060_v25, 2 }
 0x50b   :  { %2623 = vrcp.f32 %v503_v54 }
 0x515   :  { %v2624_v58 = vpop.eup %2623 }
 0x57c   :  { %v510_v56 = vpop.permute.xlu0 %509 }
 0x57d   :  { %v512_v57 = vadd.f32 %v510_v56, %v506_v55 }
 0x57f   :  { %2625 = vtanh.f32 %v512_v57 }
 0x589   :  { %v2626_v59 = vpop.eup %2625 }
 0x58a   :  { %v514_v60 = vmul.f32 %v2626_v59, %v2624_v58 }
 0x58c   :  { %516 = vrot.lane.b32.xlu1 %v514_v60, %s2861_s2 }
 0x5fe   :  { %v517_v61 = vpop.permute.xlu1 %516 }
 0x5ff   :  { %519 = vst.msk [vmem:[#allocation2 + $0x4] sm:$0x3] %vm273_vm1, %v517_v61  ;;  %2204 = vmatmul.mubr.msk.f32.vlgmr.msra.gmra.mrb[6].mxu0 %vm172_vm3, %v517_v61 }
 0x600   :  { %520 = vst.msk [vmem:[#allocation2 + $0xa] sm:$0x3] %vm275_vm2, %v517_v61  ;;  %2453 = vmatpush1.bf16.msra.mxu0 %v2926_v8  ;;  %847 = vmatprep.mubr.f32.mxu0 %v2860_v0 }
 0x601   :  { %2455 = vmatprep.subr.bf16.mxu0 %v2928_v9 }
 0x604   :  { %2457 = vmatpush1.bf16.msra.mxu0 %v2932_v16 }
 0x605   :  { %2459 = vmatprep.subr.bf16.mxu0 %v2935_v19 }
 0x608   :  { %2461 = vmatpush1.bf16.msra.mxu0 %v2938_v26 }
 0x609   :  { %2463 = vmatprep.subr.bf16.mxu0 %v2941_v28 }
 0x60c   :  { %2465 = vmatpush1.bf16.msra.mxu0 %v2946_v31 }
 0x60d   :  { %2483 = vmatprep.subr.bf16.mxu0 %v2924_v4 }
 0x6d2   :  { %v609_v2 = vpop.f32.mrb[6].mxu0 }
 0x6d3   :  { %v610_v5 = vadd.f32 %v609_v2, %v537_v62  ;;  %v611_v6 = vpop.f32.mrb[7].mxu0 }
 0x6d4   :  { %v612_v7 = vadd.f32 %v611_v6, %v538_v3 }
 0x6d5   :  { %v2205_v10 = vmul.f32 -1.442695, %v610_v5 }
 0x6d6   :  { %v2206_v4 = vmul.f32 -1.442695, %v612_v7 }
 0x6d7   :  { %2627 = vpow2.f32 %v2205_v10  ;;  %v898_v10 = vrot.slane %v3060_v25, 4 }
 0x6d8   :  { %2629 = vtanh.f32 %v612_v7 }
 0x6e1   :  { %v2628_v11 = vpop.eup %2627 }
 0x6e2   :  { %v617_v12 = vadd.f32 1.0, %v2628_v11  ;;  %v2630_v13 = vpop.eup %2629 }
 0x6e4   :  { %2631 = vrcp.f32 %v617_v12 }
 0x6e5   :  { %2633 = vpow2.f32 %v2206_v4 }
 0x6ee   :  { %v2632_v14 = vpop.eup %2631 }
 0x6ef   :  { %v628_v15 = vmul.f32 %v2632_v14, %v2630_v13  ;;  %v2634_v41 = vpop.eup %2633  ;;  %v627_v18 = vmul.f32 %v2632_v14, %v512_v57  ;;  %v778_v57 = vrot.slane %v3065_v35, 2 }
 0x6f0   :  { %v624_v17 = vadd.f32 1.0, %v2634_v41 }
 0x6f1   :  { %630 = vrot.lane.b32.xlu0 %v628_v15, %s2861_s2  ;;  %v899_v15 = vrot.slane %v3065_v35, 4 }
 0x6f2   :  { %2635 = vrcp.f32 %v624_v17 }
 0x6fc   :  { %v2636_v21 = vpop.eup %2635 }
 0x763   :  { %v631_v42 = vpop.permute.xlu0 %630 }
 0x764   :  { %v633_v20 = vadd.f32 %v631_v42, %v627_v18 }
 0x766   :  { %2637 = vtanh.f32 %v633_v20 }
 0x770   :  { %v2638_v22 = vpop.eup %2637 }
 0x771   :  { %v635_v23 = vmul.f32 %v2638_v22, %v2636_v21 }
 0x773   :  { %637 = vrot.lane.b32.xlu1 %v635_v23, %s2861_s2 }
 0x7e5   :  { %v638_v24 = vpop.permute.xlu1 %637 }
 0x7e6   :  { %640 = vst.msk [vmem:[#allocation2 + $0x6] sm:$0x3] %vm273_vm1, %v638_v24  ;;  %2207 = vmatmul.mubr.msk.f32.vlgmr.msra.gmra.mrb[4].mxu1 %vm172_vm3, %v638_v24 }
 0x7e7   :  { %641 = vst.msk [vmem:[#allocation2 + $0x8] sm:$0x3] %vm275_vm2, %v638_v24  ;;  %2469 = vmatpush1.bf16.msra.mxu1 %v2926_v8  ;;  %968 = vmatprep.mubr.f32.mxu1 %v2860_v0 }
 0x7e8   :  { %2471 = vmatprep.subr.bf16.mxu1 %v2928_v9 }
 0x7eb   :  { %2473 = vmatpush1.bf16.msra.mxu1 %v2932_v16 }
 0x7ec   :  { %2475 = vmatprep.subr.bf16.mxu1 %v2935_v19 }
 0x7ef   :  { %2477 = vmatpush1.bf16.msra.mxu1 %v2938_v26 }
 0x7f0   :  { %2479 = vmatprep.subr.bf16.mxu1 %v2941_v28 }
 0x7f3   :  { %2481 = vmatpush1.bf16.msra.mxu1 %v2946_v31 }
 0x8b9   :  { %v726_v27 = vpop.f32.mrb[4].mxu1 }
 0x8ba   :  { %v727_v29 = vadd.f32 %v726_v27, %v3060_v25  ;;  %v728_v30 = vpop.f32.mrb[5].mxu1 }
 0x8bb   :  { %v729_v37 = vadd.f32 %v728_v30, %v3065_v35 }
 0x8bc   :  { %v2208_v32 = vmul.f32 -1.442695, %v727_v29 }
 0x8bd   :  { %v2209_v63 = vmul.f32 -1.442695, %v729_v37 }
 0x8be   :  { %2639 = vpow2.f32 %v2208_v32 }
 0x8bf   :  { %2641 = vtanh.f32 %v729_v37 }
 0x8c8   :  { %v2640_v39 = vpop.eup %2639 }
 0x8c9   :  { %v734_v43 = vadd.f32 1.0, %v2640_v39  ;;  %v2642_v44 = vpop.eup %2641 }
 0x8cb   :  { %2643 = vrcp.f32 %v734_v43  ;;  %v1019_v43 = vrot.slane %v3060_v25, 6  ;;  %v1126_v25 = vld [vmem:[#allocation6 + $0xa0] sm:$0xff] }
 0x8cc   :  { %2645 = vpow2.f32 %v2209_v63 }
 0x8d5   :  { %v2644_v45 = vpop.eup %2643 }
 0x8d6   :  { %v745_v38 = vmul.f32 %v2644_v45, %v2642_v44  ;;  %v2646_v46 = vpop.eup %2645  ;;  %v744_v48 = vmul.f32 %v2644_v45, %v633_v20 }
 0x8d7   :  { %v741_v47 = vadd.f32 1.0, %v2646_v46  ;;  %v1020_v46 = vrot.slane %v3065_v35, 6  ;;  %v1130_v35 = vld [vmem:[#allocation6 + $0xc0] sm:$0xff] }
 0x8d8   :  { %747 = vrot.lane.b32.xlu0 %v745_v38, %s2861_s2 }
 0x8d9   :  { %2647 = vrcp.f32 %v741_v47 }
 0x8e3   :  { %v2648_v40 = vpop.eup %2647 }
 0x94a   :  { %v748_v49 = vpop.permute.xlu0 %747 }
 0x94b   :  { %v750_v50 = vadd.f32 %v748_v49, %v744_v48 }
 0x94d   :  { %2649 = vtanh.f32 %v750_v50 }
 0x957   :  { %v2650_v1 = vpop.eup %2649 }
 0x958   :  { %v752_v51 = vmul.f32 %v2650_v1, %v2648_v40 }
 0x95a   :  { %754 = vrot.lane.b32.xlu1 %v752_v51, %s2861_s2  ;;  %v1127_v51 = vld [vmem:[#allocation6 + $0xa8] sm:$0xff] }
 0x9cc   :  { %v755_v52 = vpop.permute.xlu1 %754 }
 0x9cd   :  { %757 = vst.msk [vmem:[#allocation2 + $0x8] sm:$0x3] %vm273_vm1, %v755_v52  ;;  %2210 = vmatmul.mubr.msk.f32.vlgmr.msra.gmra.mrb[8].mxu0 %vm172_vm3, %v755_v52 }
 0x9ce   :  { %758 = vst.msk [vmem:[#allocation2 + $0x6] sm:$0x3] %vm275_vm2, %v755_v52  ;;  %2485 = vmatpush1.bf16.msra.mxu0 %v2926_v8  ;;  %1089 = vmatprep.mubr.f32.mxu0 %v2860_v0  ;;  %v1129_v52 = vld [vmem:[#allocation6 + $0xb8] sm:$0xff] }
 0x9cf   :  { %2487 = vmatprep.subr.bf16.mxu0 %v2928_v9 }
 0x9d2   :  { %2489 = vmatpush1.bf16.msra.mxu0 %v2932_v16 }
 0x9d3   :  { %2491 = vmatprep.subr.bf16.mxu0 %v2935_v19 }
 0x9d6   :  { %2493 = vmatpush1.bf16.msra.mxu0 %v2938_v26 }
 0x9d7   :  { %2495 = vmatprep.subr.bf16.mxu0 %v2941_v28 }
 0x9da   :  { %2497 = vmatpush1.bf16.msra.mxu0 %v2946_v31 }
 0xaa0   :  { %v849_v54 = vpop.f32.mrb[8].mxu0 }
 0xaa1   :  { %v850_v55 = vadd.f32 %v849_v54, %v777_v53  ;;  %v851_v56 = vpop.f32.mrb[9].mxu0  ;;  %v2498_v53 = vpack.c.bf16 %v1129_v52, %v1127_v51  ;;  %v1128_v54 = vld [vmem:[#allocation6 + $0xb0] sm:$0xff] }
 0xaa2   :  { %v852_v9 = vadd.f32 %v851_v56, %v778_v57  ;;  %v1133_v56 = vld [vmem:[#allocation6 + $0xd8] sm:$0xff] }
 0xaa3   :  { %v2211_v8 = vmul.f32 -1.442695, %v850_v55  ;;  %v1131_v55 = vld [vmem:[#allocation6 + $0xc8] sm:$0xff]  ;;  %2499 = vmatprep.subr.bf16.mxu1 %v2498_v53 }
 0xaa4   :  { %v2212_v28 = vmul.f32 -1.442695, %v852_v9  ;;  %v2502_v57 = vpack.c.bf16 %v1133_v56, %v1131_v55 }
 0xaa5   :  { %2651 = vpow2.f32 %v2211_v8  ;;  %v2500_v8 = vpack.c.bf16 %v1128_v54, %v1126_v25 }
 0xaa6   :  { %2653 = vtanh.f32 %v852_v9  ;;  %v1132_v9 = vld [vmem:[#allocation6 + $0xd0] sm:$0xff] }
 0xaaf   :  { %v2652_v58 = vpop.eup %2651 }
 0xab0   :  { %v857_v16 = vadd.f32 1.0, %v2652_v58  ;;  %v2654_v19 = vpop.eup %2653  ;;  %v2504_v58 = vpack.c.bf16 %v1132_v9, %v1130_v35 }
 0xab2   :  { %2655 = vrcp.f32 %v857_v16 }
 0xab3   :  { %2657 = vpow2.f32 %v2212_v28 }
 0xabc   :  { %v2656_v26 = vpop.eup %2655 }
 0xabd   :  { %v868_v59 = vmul.f32 %v2656_v26, %v2654_v19  ;;  %v2658_v31 = vpop.eup %2657  ;;  %v867_v61 = vmul.f32 %v2656_v26, %v750_v50 }
 0xabe   :  { %v864_v60 = vadd.f32 1.0, %v2658_v31  ;;  %v1135_v31 = vld [vmem:[#allocation6 + $0xe8] sm:$0xff] }
 0xabf   :  { %870 = vrot.lane.b32.xlu0 %v868_v59, %s2861_s2 }
 0xac0   :  { %2659 = vrcp.f32 %v864_v60  ;;  %v1137_v60 = vld [vmem:[#allocation6 + $0xf8] sm:$0xff] }
 0xaca   :  { %v2660_v3 = vpop.eup %2659 }
 0xb31   :  { %v871_v62 = vpop.permute.xlu0 %870 }
 0xb32   :  { %v873_v2 = vadd.f32 %v871_v62, %v867_v61  ;;  %v2506_v62 = vpack.c.bf16 %v1137_v60, %v1135_v31 }
 0xb34   :  { %2661 = vtanh.f32 %v873_v2 }
 0xb3e   :  { %v2662_v5 = vpop.eup %2661 }
 0xb3f   :  { %v875_v6 = vmul.f32 %v2662_v5, %v2660_v3  ;;  %v1136_v3 = vld [vmem:[#allocation6 + $0xf0] sm:$0xff] }
 0xb41   :  { %877 = vrot.lane.b32.xlu1 %v875_v6, %s2861_s2  ;;  %v1237_v6 = vld [vmem:[#allocation6 + $0x120] sm:$0xff] }
 0xbb3   :  { %v878_v7 = vpop.permute.xlu1 %877 }
 0xbb4   :  { %880 = vst.msk [vmem:[#allocation2 + $0xa] sm:$0x3] %vm273_vm1, %v878_v7  ;;  %2213 = vmatmul.mubr.msk.f32.vlgmr.msra.gmra.mrb[6].mxu1 %vm172_vm3, %v878_v7 }
 0xbb5   :  { %881 = vst.msk [vmem:[#allocation2 + $0x4] sm:$0x3] %vm275_vm2, %v878_v7  ;;  %1225 = vmatprep.mubr.f32.mxu1 %v2860_v0  ;;  %2501 = vmatpush1.bf16.msra.mxu1 %v2500_v8  ;;  %v1238_v7 = vld [vmem:[#allocation6 + $0x130] sm:$0xff] }
 0xbb6   :  { %2503 = vmatprep.subr.bf16.mxu1 %v2502_v57 }
 0xbb9   :  { %2505 = vmatpush1.bf16.msra.mxu1 %v2504_v58 }
 0xbba   :  { %2507 = vmatprep.subr.bf16.mxu1 %v2506_v62 }
 0xc87   :  { %v970_v11 = vpop.f32.mrb[6].mxu1 }
 0xc88   :  { %v971_v12 = vadd.f32 %v970_v11, %v898_v10  ;;  %v972_v13 = vpop.f32.mrb[7].mxu1  ;;  %v3099_v10 = vpack.c.bf16 %v1238_v7, %v1237_v6  ;;  %v1139_v11 = vld [vmem:[#allocation6 + $0x108] sm:$0xff] }
 0xc89   :  { %v973_v4 = vadd.f32 %v972_v13, %v899_v15  ;;  %v1138_v13 = vld [vmem:[#allocation6 + $0x100] sm:$0xff] }
 0xc8a   :  { %v2214_v14 = vmul.f32 -1.442695, %v971_v12  ;;  %v1141_v12 = vld [vmem:[#allocation6 + $0x118] sm:$0xff] }
 0xc8b   :  { %v2215_v21 = vmul.f32 -1.442695, %v973_v4  ;;  %v2510_v15 = vpack.c.bf16 %v1141_v12, %v1139_v11 }
 0xc8c   :  { %2663 = vpow2.f32 %v2214_v14  ;;  %v2862_v14 = vmov 0.0|0.0  }
 0xc8d   :  { %2665 = vtanh.f32 %v973_v4  ;;  %2514 = vmatprep.subr.bf16.mxu0 %v2862_v14  ;;  %v1140_v4 = vld [vmem:[#allocation6 + $0x110] sm:$0xff] }
 0xc96   :  { %v2664_v41 = vpop.eup %2663 }
 0xc97   :  { %v978_v17 = vadd.f32 1.0, %v2664_v41  ;;  %v2666_v18 = vpop.eup %2665  ;;  %v1239_v41 = vld [vmem:[#allocation6 + $0x140] sm:$0xff] }
 0xc99   :  { %2667 = vrcp.f32 %v978_v17  ;;  %v1240_v17 = vld [vmem:[#allocation6 + $0x150] sm:$0xff] }
 0xc9a   :  { %2669 = vpow2.f32 %v2215_v21 }
 0xca3   :  { %v2668_v42 = vpop.eup %2667 }
 0xca4   :  { %v989_v20 = vmul.f32 %v2668_v42, %v2666_v18  ;;  %v2670_v22 = vpop.eup %2669  ;;  %v988_v24 = vmul.f32 %v2668_v42, %v873_v2  ;;  %v1134_v2 = vld [vmem:[#allocation6 + $0xe0] sm:$0xff]  ;;  %v2512_v18 = vpack.c.bf16 %v1140_v4, %v1138_v13  ;;  %v3103_v42 = vpack.c.bf16 %v1240_v17, %v1239_v41 }
 0xca5   :  { %v985_v23 = vadd.f32 1.0, %v2670_v22  ;;  %v2508_v5 = vpack.c.bf16 %v1136_v3, %v1134_v2 }
 0xca6   :  { %991 = vrot.lane.b32.xlu0 %v989_v20, %s2861_s2 }
 0xca7   :  { %2671 = vrcp.f32 %v985_v23  ;;  %2509 = vmatpush1.bf16.msra.mxu1 %v2508_v5 }
 0xca8   :  { %2511 = vmatprep.subr.bf16.mxu1 %v2510_v15 }
 0xcab   :  { %2513 = vmatpush1.bf16.msra.mxu1 %v2512_v18 }
 0xcac   :  { %2538 = vmatprep.subr.bf16.mxu1 %v2862_v14 }
 0xcb1   :  { %v2672_v30 = vpop.eup %2671 }
 0xd18   :  { %v992_v27 = vpop.permute.xlu0 %991 }
 0xd19   :  { %v994_v29 = vadd.f32 %v992_v27, %v988_v24 }
 0xd1b   :  { %2673 = vtanh.f32 %v994_v29 }
 0xd25   :  { %v2674_v32 = vpop.eup %2673 }
 0xd26   :  { %v996_v37 = vmul.f32 %v2674_v32, %v2672_v30  ;;  %v3130_v32 = vld [vmem:[#allocation8 + $0x1] ss:$4 sm:$0x3] }
 0xd28   :  { %998 = vrot.lane.b32.xlu1 %v996_v37, %s2861_s2  ;;  %v1148_v37 = vrot.slane %v3130_v32, %v2973_v34 }
 0xd9a   :  { %v999_v39 = vpop.permute.xlu1 %998 }
 0xd9b   :  { %1001 = vst.msk [vmem:[#allocation2 + $0xc] sm:$0x3] %vm273_vm1, %v999_v39  ;;  %2216 = vmatmul.mubr.msk.f32.vlgmr.msra.gmra.mrb[10].mxu0 %vm172_vm3, %v999_v39 }
 0xd9c   :  { %1002 = vst.msk [vmem:[#allocation2 + $0x2] sm:$0x3] %vm275_vm2, %v999_v39  ;;  %2516 = vmatpush3.bf16.msra.mxu0 %v3099_v10  ;;  %2286 = vmatprep.mubr.msk.f32.mxu0 %vm2863_vm4, %v2860_v0 }
 0xd9d   :  { %2517 = vmatprep.subr.bf16.mxu0 %v2862_v14 }
 0xda0   :  { %2519 = vmatpush3.bf16.msra.mxu0 %v3103_v42 }
 0xda1   :  { %2520 = vmatprep.subr.bf16.mxu0 %v2862_v14 }
 0xda3   :  { %2287 = vmatmul.mubr.f32.vlgmr.msra.gmra.mrb[12].mxu0 %v2860_v0 }
 0xda4   :  { %2522 = vmatpush3.bf16.msra.mxu0 %v3099_v10  ;;  %2297 = vmatprep.mubr.msk.f32.mxu0 %vm2863_vm4, %v2860_v0 }
 0xda5   :  { %2523 = vmatprep.subr.bf16.mxu0 %v2862_v14 }
 0xda8   :  { %2525 = vmatpush3.bf16.msra.mxu0 %v3103_v42 }
 0xda9   :  { %2526 = vmatprep.subr.bf16.mxu0 %v2862_v14 }
 0xe6e   :  { %v1091_v44 = vpop.f32.mrb[10].mxu0 }
 0xe6f   :  { %v1092_v45 = vadd.f32 %v1091_v44, %v1019_v43  ;;  %v1093_v38 = vpop.f32.mrb[11].mxu0 }
 0xe70   :  { %v1094_v47 = vadd.f32 %v1093_v38, %v1020_v46 }
 0xe71   :  { %v2217_v63 = vmul.f32 -1.442695, %v1092_v45 }
 0xe72   :  { %v2218_v16 = vmul.f32 -1.442695, %v1094_v47 }
 0xe73   :  { %2675 = vpow2.f32 %v2217_v63 }
 0xe74   :  { %2677 = vtanh.f32 %v1094_v47 }
 0xe7d   :  { %v2676_v48 = vpop.eup %2675 }
 0xe7e   :  { %v1099_v49 = vadd.f32 1.0, %v2676_v48  ;;  %v2678_v50 = vpop.eup %2677 }
 0xe80   :  { %2679 = vrcp.f32 %v1099_v49 }
 0xe81   :  { %2681 = vpow2.f32 %v2218_v16 }
 0xe8a   :  { %v2680_v40 = vpop.eup %2679 }
 0xe8b   :  { %v1110_v1 = vmul.f32 %v2680_v40, %v2678_v50  ;;  %v2682_v19 = vpop.eup %2681  ;;  %v1109_v59 = vmul.f32 %v2680_v40, %v994_v29  ;;  %v1310_v29 = vpop.f32.mrb[12].mxu0 }
 0xe8c   :  { %v1106_v26 = vadd.f32 1.0, %v2682_v19  ;;  %v2288_v30 = vpop.f32.mrb[13].mxu0 }
 0xe8d   :  { %1112 = vrot.lane.b32.xlu0 %v1110_v1, %s2861_s2 }
 0xe8e   :  { %2683 = vrcp.f32 %v1106_v26 }
 0xe98   :  { %v2684_v20 = vpop.eup %2683 }
 0xeff   :  { %v1113_v28 = vpop.permute.xlu0 %1112 }
 0xf00   :  { %v1115_v61 = vadd.f32 %v1113_v28, %v1109_v59 }
 0xf02   :  { %2685 = vtanh.f32 %v1115_v61 }
 0xf0c   :  { %v2686_v21 = vpop.eup %2685 }
 0xf0d   :  { %v1117_v22 = vmul.f32 %v2686_v21, %v2684_v20 }
 0xf0f   :  { %1119 = vrot.lane.b32.xlu1 %v1117_v22, %s2861_s2 }
 0xf81   :  { %v1120_v23 = vpop.permute.xlu1 %1119 }
 0xf82   :  { %1122 = vst.msk [vmem:[#allocation2 + $0xe] sm:$0x3] %vm273_vm1, %v1120_v23 }
 0xf83   :  { %1123 = vst.msk [vmem:[#allocation2] sm:$0x3] %vm275_vm2, %v1120_v23 }
 0xf89   :  { %v1125_v27 = vld [vmem:[#allocation2 + $0x8] sm:$0xff] }
 0xf8a   :  { %v1124_v24 = vld [vmem:[#allocation2] sm:$0xff] }
 0xf8b   :  { %2219 = vmatmul.mubr.msk.f32.vlgmr.msra.gmra.mrb[8].mxu1 %vm172_vm3, %v1124_v24 }
 0xf8c   :  { %1230 = vmatprep.mubr.f32.mxu1 %v2860_v0  ;;  %2540 = vmatpush3.bf16.msra.mxu1 %v3099_v10 }
 0xf8d   :  { %2541 = vmatprep.subr.bf16.mxu1 %v2862_v14 }
 0xf8f   :  { %2220 = vmatmul.mubr.msk.f32.gmra.mrb[10].mxu1 %vm172_vm3, %v1125_v27 }
 0xf90   :  { %2543 = vmatpush3.bf16.msra.mxu1 %v3103_v42  ;;  %2330 = vmatprep.mubr.msk.f32.mxu1 %vm2863_vm4, %v2860_v0 }
 0xf91   :  { %2550 = vmatprep.subr.bf16.mxu1 %v2862_v14 }
0x105e   :  { %v1227_v39 = vpop.f32.mrb[8].mxu1 }
0x105f   :  { %v3134_v43 = vadd.f32 %v1227_v39, %v1148_v37  ;;  %v1229_v44 = vpop.f32.mrb[9].mxu1 }
0x1061   :  { %v1311_v45 = vadd.f32 %v1310_v29, %v3134_v43  ;;  %v1342_v57 = vrot.slane %v3134_v43, 2  ;;  %v1443_v11 = vrot.slane %v3134_v43, 4  ;;  %v1544_v44 = vrot.slane %v3134_v43, 6 }
0x1062   :  { %v1232_v38 = vpop.f32.mrb[10].mxu1 }
0x1063   :  { %2687 = vtanh.f32 %v1311_v45  ;;  %v3137_v63 = vadd.f32 %v1232_v38, %v1148_v37  ;;  %v3139_v46 = vpop.f32.mrb[11].mxu1  ;;  %v2221_v48 = vmul.f32 -1.442695, %v1311_v45 }
0x1065   :  { %2689 = vpow2.f32 %v2221_v48 }
0x106d   :  { %v2688_v47 = vpop.eup %2687 }
0x106e   :  { %1323 = vrot.lane.b32.xlu0 %v2688_v47, %s2861_s2 }
0x106f   :  { %v2690_v49 = vpop.eup %2689 }
0x1070   :  { %v1317_v50 = vadd.f32 1.0, %v2690_v49 }
0x1072   :  { %2691 = vrcp.f32 %v1317_v50 }
0x107c   :  { %v2692_v40 = vpop.eup %2691 }
0x107d   :  { %v1321_v52 = vmul.f32 0.0, %v2692_v40 }
0x10e0   :  { %v1324_v1 = vpop.permute.xlu0 %1323 }
0x10e1   :  { %v1326_v51 = vmul.f32 %v2692_v40, %v1324_v1 }
0x10e3   :  { %1328 = vrot.lane.b32.xlu1 %v1326_v51, %s2864_s23 }
0x1155   :  { %v1329_v25 = vpop.permute.xlu1 %1328 }
0x1156   :  { %v1331_v53 = vadd.f32 %v1329_v25, %v1321_v52 }
0x1158   :  { %2693 = vtanh.f32 %v1331_v53 }
0x1162   :  { %v2694_v54 = vpop.eup %2693 }
0x1163   :  { %1334 = vrot.lane.b32.xlu0 %v2694_v54, %s2861_s2 }
0x11d5   :  { %v1335_v55 = vpop.permute.xlu0 %1334 }
0x11d6   :  { %v1337_v56 = vmul.f32 %v2692_v40, %v1335_v55 }
0x11d8   :  { %1339 = vrot.lane.b32.xlu1 %v1337_v56, %s2864_s23 }
0x124a   :  { %v1340_v8 = vpop.permute.xlu1 %1339 }
0x124b   :  { %2298 = vmatmul.mubr.msk.f32.vlgmr.msra.gmra.mrb[14].mxu0 %vm1241_vm5, %v1340_v8 }
0x124c   :  { %2528 = vmatpush3.bf16.msra.mxu0 %v3099_v10  ;;  %2308 = vmatprep.mubr.msk.f32.mxu0 %vm2863_vm4, %v2860_v0 }
0x124d   :  { %2529 = vmatprep.subr.bf16.mxu0 %v2862_v14 }
0x1250   :  { %2531 = vmatpush3.bf16.msra.mxu0 %v3103_v42 }
0x1251   :  { %2532 = vmatprep.subr.bf16.mxu0 %v2862_v14 }
0x131e   :  { %v1412_v35 = vpop.f32.mrb[14].mxu0 }
0x131f   :  { %v1413_v9 = vadd.f32 %v1412_v35, %v1342_v57  ;;  %v2299_v58 = vpop.f32.mrb[15].mxu0 }
0x1321   :  { %2695 = vtanh.f32 %v1413_v9  ;;  %v2223_v19 = vmul.f32 -1.442695, %v1413_v9 }
0x1323   :  { %2697 = vpow2.f32 %v2223_v19 }
0x132b   :  { %v2696_v16 = vpop.eup %2695 }
0x132c   :  { %1425 = vrot.lane.b32.xlu0 %v2696_v16, %s2861_s2 }
0x132d   :  { %v2698_v26 = vpop.eup %2697 }
0x132e   :  { %v1419_v59 = vadd.f32 1.0, %v2698_v26 }
0x1330   :  { %2699 = vrcp.f32 %v1419_v59 }
0x133a   :  { %v2700_v28 = vpop.eup %2699 }
0x133b   :  { %v1423_v61 = vmul.f32 %v2700_v28, %v1331_v53 }
0x139e   :  { %v1426_v31 = vpop.permute.xlu0 %1425 }
0x139f   :  { %v1428_v60 = vmul.f32 %v2700_v28, %v1426_v31 }
0x13a1   :  { %1430 = vrot.lane.b32.xlu1 %v1428_v60, %s2864_s23 }
0x1413   :  { %v1431_v62 = vpop.permute.xlu1 %1430 }
0x1414   :  { %v1433_v2 = vadd.f32 %v1431_v62, %v1423_v61 }
0x1416   :  { %2701 = vtanh.f32 %v1433_v2 }
0x1420   :  { %v2702_v3 = vpop.eup %2701 }
0x1421   :  { %1436 = vrot.lane.b32.xlu0 %v2702_v3, %s2861_s2 }
0x1493   :  { %v1437_v5 = vpop.permute.xlu0 %1436 }
0x1494   :  { %v1439_v6 = vmul.f32 %v2700_v28, %v1437_v5 }
0x1496   :  { %1441 = vrot.lane.b32.xlu1 %v1439_v6, %s2864_s23 }
0x1508   :  { %v1442_v7 = vpop.permute.xlu1 %1441 }
0x1509   :  { %2309 = vmatmul.mubr.msk.f32.vlgmr.msra.gmra.mrb[16].mxu0 %vm1241_vm5, %v1442_v7  ;;  %v1745_v7 = vrot.slane %v3137_v63, 2 }
0x150a   :  { %2534 = vmatpush3.bf16.msra.mxu0 %v3099_v10  ;;  %2319 = vmatprep.mubr.msk.f32.mxu0 %vm2863_vm4, %v2860_v0 }
0x150b   :  { %2535 = vmatprep.subr.bf16.mxu0 %v2862_v14 }
0x150e   :  { %2537 = vmatpush3.bf16.msra.mxu0 %v3103_v42 }
0x150f   :  { %2544 = vmatprep.subr.bf16.mxu0 %v2862_v14 }
0x15dc   :  { %v1513_v12 = vpop.f32.mrb[16].mxu0 }
0x15dd   :  { %v1514_v13 = vadd.f32 %v1513_v12, %v1443_v11  ;;  %v2310_v15 = vpop.f32.mrb[17].mxu0 }
0x15df   :  { %2703 = vtanh.f32 %v1514_v13  ;;  %v2225_v41 = vmul.f32 -1.442695, %v1514_v13 }
0x15e1   :  { %2705 = vpow2.f32 %v2225_v41 }
0x15e9   :  { %v2704_v4 = vpop.eup %2703 }
0x15ea   :  { %1526 = vrot.lane.b32.xlu0 %v2704_v4, %s2861_s2 }
0x15eb   :  { %v2706_v17 = vpop.eup %2705 }
0x15ec   :  { %v1520_v18 = vadd.f32 1.0, %v2706_v17 }
0x15ee   :  { %2707 = vrcp.f32 %v1520_v18 }
0x15f8   :  { %v2708_v20 = vpop.eup %2707 }
0x15f9   :  { %v1524_v23 = vmul.f32 %v2708_v20, %v1433_v2 }
0x165c   :  { %v1527_v21 = vpop.permute.xlu0 %1526 }
0x165d   :  { %v1529_v22 = vmul.f32 %v2708_v20, %v1527_v21 }
0x165f   :  { %1531 = vrot.lane.b32.xlu1 %v1529_v22, %s2864_s23 }
0x16d1   :  { %v1532_v24 = vpop.permute.xlu1 %1531 }
0x16d2   :  { %v1534_v27 = vadd.f32 %v1532_v24, %v1524_v23 }
0x16d4   :  { %2709 = vtanh.f32 %v1534_v27 }
0x16de   :  { %v2710_v29 = vpop.eup %2709 }
0x16df   :  { %1537 = vrot.lane.b32.xlu0 %v2710_v29, %s2861_s2  ;;  %v1846_v29 = vrot.slane %v3137_v63, 4 }
0x1751   :  { %v1538_v30 = vpop.permute.xlu0 %1537 }
0x1752   :  { %v1540_v37 = vmul.f32 %v2708_v20, %v1538_v30 }
0x1754   :  { %1542 = vrot.lane.b32.xlu1 %v1540_v37, %s2864_s23 }
0x17c6   :  { %v1543_v39 = vpop.permute.xlu1 %1542 }
0x17c7   :  { %2320 = vmatmul.mubr.msk.f32.vlgmr.msra.gmra.mrb[18].mxu0 %vm1241_vm5, %v1543_v39 }
0x17c8   :  { %2546 = vmatpush3.bf16.msra.mxu0 %v3099_v10  ;;  %2341 = vmatprep.mubr.msk.f32.mxu0 %vm2863_vm4, %v2860_v0 }
0x17c9   :  { %2547 = vmatprep.subr.bf16.mxu0 %v2862_v14 }
0x17cc   :  { %2549 = vmatpush3.bf16.msra.mxu0 %v3103_v42 }
0x17cd   :  { %2556 = vmatprep.subr.bf16.mxu0 %v2862_v14 }
0x189a   :  { %v1614_v45 = vpop.f32.mrb[18].mxu0 }
0x189b   :  { %v1615_v38 = vadd.f32 %v1614_v45, %v1544_v44  ;;  %v2321_v47 = vpop.f32.mrb[19].mxu0 }
0x189d   :  { %2711 = vtanh.f32 %v1615_v38  ;;  %v2227_v49 = vmul.f32 -1.442695, %v1615_v38 }
0x189f   :  { %2713 = vpow2.f32 %v2227_v49 }
0x18a7   :  { %v2712_v48 = vpop.eup %2711 }
0x18a8   :  { %1627 = vrot.lane.b32.xlu0 %v2712_v48, %s2861_s2 }
0x18a9   :  { %v2714_v50 = vpop.eup %2713 }
0x18aa   :  { %v1621_v40 = vadd.f32 1.0, %v2714_v50 }
0x18ac   :  { %2715 = vrcp.f32 %v1621_v40 }
0x18b6   :  { %v2716_v1 = vpop.eup %2715 }
0x18b7   :  { %v1625_v25 = vmul.f32 %v2716_v1, %v1534_v27 }
0x191a   :  { %v1628_v51 = vpop.permute.xlu0 %1627 }
0x191b   :  { %v1630_v52 = vmul.f32 %v2716_v1, %v1628_v51 }
0x191d   :  { %1632 = vrot.lane.b32.xlu1 %v1630_v52, %s2864_s23 }
0x198f   :  { %v1633_v53 = vpop.permute.xlu1 %1632 }
0x1990   :  { %v1635_v43 = vadd.f32 %v1633_v53, %v1625_v25 }
0x1992   :  { %2717 = vtanh.f32 %v1635_v43 }
0x199c   :  { %v2718_v54 = vpop.eup %2717 }
0x199d   :  { %1638 = vrot.lane.b32.xlu0 %v2718_v54, %s2861_s2 }
0x1a0f   :  { %v1639_v55 = vpop.permute.xlu0 %1638 }
0x1a10   :  { %v1641_v56 = vmul.f32 %v2716_v1, %v1639_v55 }
0x1a12   :  { %1643 = vrot.lane.b32.xlu1 %v1641_v56, %s2864_s23 }
0x1a84   :  { %v1644_v8 = vpop.permute.xlu1 %1643 }
0x1a85   :  { %2331 = vmatmul.mubr.msk.f32.vlgmr.msra.gmra.mrb[12].mxu1 %vm1241_vm5, %v1644_v8 }
0x1a86   :  { %2552 = vmatpush3.bf16.msra.mxu1 %v3099_v10  ;;  %2352 = vmatprep.mubr.msk.f32.mxu1 %vm2863_vm4, %v2860_v0 }
0x1a87   :  { %2553 = vmatprep.subr.bf16.mxu1 %v2862_v14 }
0x1a8a   :  { %2555 = vmatpush3.bf16.msra.mxu1 %v3103_v42 }
0x1b58   :  { %v1713_v57 = vpop.f32.mrb[12].mxu1 }
0x1b59   :  { %v1714_v35 = vadd.f32 %v1713_v57, %v3137_v63  ;;  %v2332_v9 = vpop.f32.mrb[13].mxu1 }
0x1b5b   :  { %2719 = vtanh.f32 %v1714_v35  ;;  %v2229_v16 = vmul.f32 -1.442695, %v1714_v35 }
0x1b5d   :  { %2721 = vpow2.f32 %v2229_v16  ;;  %v1947_v16 = vrot.slane %v3137_v63, 6 }
0x1b65   :  { %v2720_v58 = vpop.eup %2719 }
0x1b66   :  { %1726 = vrot.lane.b32.xlu0 %v2720_v58, %s2861_s2 }
0x1b67   :  { %v2722_v19 = vpop.eup %2721 }
0x1b68   :  { %v1720_v26 = vadd.f32 1.0, %v2722_v19 }
0x1b6a   :  { %2723 = vrcp.f32 %v1720_v26 }
0x1b74   :  { %v2724_v59 = vpop.eup %2723 }
0x1b75   :  { %v1724_v60 = vmul.f32 %v2724_v59, %v1635_v43 }
0x1bd8   :  { %v1727_v28 = vpop.permute.xlu0 %1726 }
0x1bd9   :  { %v1729_v31 = vmul.f32 %v2724_v59, %v1727_v28 }
0x1bdb   :  { %1731 = vrot.lane.b32.xlu1 %v1729_v31, %s2864_s23 }
0x1c4d   :  { %v1732_v61 = vpop.permute.xlu1 %1731 }
0x1c4e   :  { %v1734_v62 = vadd.f32 %v1732_v61, %v1724_v60 }
0x1c50   :  { %2725 = vtanh.f32 %v1734_v62 }
0x1c5a   :  { %v2726_v2 = vpop.eup %2725 }
0x1c5b   :  { %1737 = vrot.lane.b32.xlu0 %v2726_v2, %s2861_s2 }
0x1ccd   :  { %v1738_v3 = vpop.permute.xlu0 %1737 }
0x1cce   :  { %v1740_v5 = vmul.f32 %v2724_v59, %v1738_v3 }
0x1cd0   :  { %1742 = vrot.lane.b32.xlu1 %v1740_v5, %s2864_s23 }
0x1d42   :  { %v1743_v6 = vpop.permute.xlu1 %1742 }
0x1d43   :  { %2342 = vmatmul.mubr.msk.f32.vlgmr.msra.gmra.mrb[20].mxu0 %vm1241_vm5, %v1743_v6 }
0x1d44   :  { %2558 = vmatpush3.bf16.msra.mxu0 %v3099_v10  ;;  %2363 = vmatprep.mubr.msk.f32.mxu0 %vm2863_vm4, %v2860_v0 }
0x1d45   :  { %2559 = vmatprep.subr.bf16.mxu0 %v2862_v14 }
0x1d48   :  { %2561 = vmatpush3.bf16.msra.mxu0 %v3103_v42 }
0x1e16   :  { %v1815_v11 = vpop.f32.mrb[20].mxu0 }
0x1e17   :  { %v1816_v12 = vadd.f32 %v1815_v11, %v1745_v7  ;;  %v2343_v13 = vpop.f32.mrb[21].mxu0  ;;  %v2080_v7 = vld [vmem:[#allocation6 + $0x168] sm:$0xff]  ;;  %v2082_v11 = vld [vmem:[#allocation6 + $0x178] sm:$0xff] }
0x1e18   :  { %v2562_v13 = vpack.c.bf16 %v2082_v11, %v2080_v7 }
0x1e19   :  { %2727 = vtanh.f32 %v1816_v12  ;;  %v2231_v4 = vmul.f32 -1.442695, %v1816_v12  ;;  %v2079_v12 = vld [vmem:[#allocation6 + $0x160] sm:$0xff] }
0x1e1a   :  { %2563 = vmatprep.subr.bf16.mxu1 %v2562_v13 }
0x1e1b   :  { %2729 = vpow2.f32 %v2231_v4  ;;  %v2084_v4 = vld [vmem:[#allocation6 + $0x188] sm:$0xff] }
0x1e23   :  { %v2728_v15 = vpop.eup %2727 }
0x1e24   :  { %1828 = vrot.lane.b32.xlu0 %v2728_v15, %s2861_s2  ;;  %v2081_v15 = vld [vmem:[#allocation6 + $0x170] sm:$0xff] }
0x1e25   :  { %v2730_v41 = vpop.eup %2729 }
0x1e26   :  { %v1822_v10 = vadd.f32 1.0, %v2730_v41  ;;  %v2086_v41 = vld [vmem:[#allocation6 + $0x198] sm:$0xff] }
0x1e28   :  { %2731 = vrcp.f32 %v1822_v10  ;;  %v2564_v10 = vpack.c.bf16 %v2081_v15, %v2079_v12 }
0x1e32   :  { %v2732_v17 = vpop.eup %2731 }
0x1e33   :  { %v1826_v14 = vmul.f32 %v2732_v17, %v1734_v62 }
0x1e96   :  { %v1829_v18 = vpop.permute.xlu0 %1828 }
0x1e97   :  { %v1831_v20 = vmul.f32 %v2732_v17, %v1829_v18  ;;  %v2083_v18 = vld [vmem:[#allocation6 + $0x180] sm:$0xff] }
0x1e99   :  { %1833 = vrot.lane.b32.xlu1 %v1831_v20, %s2864_s23  ;;  %v2085_v20 = vld [vmem:[#allocation6 + $0x190] sm:$0xff] }
0x1f0b   :  { %v1834_v42 = vpop.permute.xlu1 %1833 }
0x1f0c   :  { %v1836_v21 = vadd.f32 %v1834_v42, %v1826_v14  ;;  %v2088_v14 = vld [vmem:[#allocation6 + $0x1a8] sm:$0xff]  ;;  %v2090_v42 = vld [vmem:[#allocation6 + $0x1b8] sm:$0xff] }
0x1f0e   :  { %2733 = vtanh.f32 %v1836_v21 }
0x1f18   :  { %v2734_v22 = vpop.eup %2733 }
0x1f19   :  { %1839 = vrot.lane.b32.xlu0 %v2734_v22, %s2861_s2 }
0x1f8b   :  { %v1840_v23 = vpop.permute.xlu0 %1839 }
0x1f8c   :  { %v1842_v24 = vmul.f32 %v2732_v17, %v1840_v23  ;;  %v2566_v17 = vpack.c.bf16 %v2086_v41, %v2084_v4  ;;  %v2570_v23 = vpack.c.bf16 %v2090_v42, %v2088_v14 }
0x1f8e   :  { %1844 = vrot.lane.b32.xlu1 %v1842_v24, %s2864_s23  ;;  %v2087_v24 = vld [vmem:[#allocation6 + $0x1a0] sm:$0xff] }
0x2000   :  { %v1845_v27 = vpop.permute.xlu1 %1844 }
0x2001   :  { %2353 = vmatmul.mubr.msk.f32.vlgmr.msra.gmra.mrb[14].mxu1 %vm1241_vm5, %v1845_v27  ;;  %v2089_v27 = vld [vmem:[#allocation6 + $0x1b0] sm:$0xff] }
0x2002   :  { %2170 = vmatprep.mubr.f32.mxu1 %v2860_v0  ;;  %v1152_v0 = vrot.slane %v3130_v32, %v68_v36  ;;  %2565 = vmatpush1.bf16.msra.mxu1 %v2564_v10 }
0x2003   :  { %2567 = vmatprep.subr.bf16.mxu1 %v2566_v17 }
0x2004   :  { %v1235_v52 = vadd.f32 %v3139_v46, %v1152_v0 }
0x2006   :  { %v2236_v43 = vmul.f32 -1.442695, %v1235_v52 }
0x20d4   :  { %v1916_v30 = vpop.f32.mrb[14].mxu1 }
0x20d5   :  { %v1917_v37 = vadd.f32 %v1916_v30, %v1846_v29  ;;  %v2354_v39 = vpop.f32.mrb[15].mxu1  ;;  %v2092_v29 = vld [vmem:[#allocation6 + $0x1c8] sm:$0xff]  ;;  %v2094_v30 = vld [vmem:[#allocation6 + $0x1d8] sm:$0xff] }
0x20d6   :  { %v2572_v39 = vpack.c.bf16 %v2089_v27, %v2087_v24 }
0x20d7   :  { %2735 = vtanh.f32 %v1917_v37  ;;  %v2233_v45 = vmul.f32 -1.442695, %v1917_v37 }
0x20d9   :  { %2737 = vpow2.f32 %v2233_v45  ;;  %v2574_v45 = vpack.c.bf16 %v2094_v30, %v2092_v29 }
0x20e1   :  { %v2736_v44 = vpop.eup %2735 }
0x20e2   :  { %1929 = vrot.lane.b32.xlu0 %v2736_v44, %s2861_s2 }
0x20e3   :  { %v2738_v38 = vpop.eup %2737 }
0x20e4   :  { %v1923_v47 = vadd.f32 1.0, %v2738_v38  ;;  %v2091_v38 = vld [vmem:[#allocation6 + $0x1c0] sm:$0xff] }
0x20e6   :  { %2739 = vrcp.f32 %v1923_v47  ;;  %v2093_v47 = vld [vmem:[#allocation6 + $0x1d0] sm:$0xff] }
0x20f0   :  { %v2740_v48 = vpop.eup %2739 }
0x20f1   :  { %v1927_v40 = vmul.f32 %v2740_v48, %v1836_v21  ;;  %v2568_v21 = vpack.c.bf16 %v2085_v20, %v2083_v18 }
0x20f3   :  { %2569 = vmatpush1.bf16.msra.mxu1 %v2568_v21 }
0x20f4   :  { %2571 = vmatprep.subr.bf16.mxu1 %v2570_v23 }
0x20f7   :  { %2573 = vmatpush1.bf16.msra.mxu1 %v2572_v39 }
0x20f8   :  { %2575 = vmatprep.subr.bf16.mxu1 %v2574_v45 }
0x2154   :  { %v1930_v49 = vpop.permute.xlu0 %1929 }
0x2155   :  { %v1932_v50 = vmul.f32 %v2740_v48, %v1930_v49  ;;  %v2576_v49 = vpack.c.bf16 %v2093_v47, %v2091_v38 }
0x2157   :  { %1934 = vrot.lane.b32.xlu1 %v1932_v50, %s2864_s23  ;;  %2577 = vmatpush1.bf16.msra.mxu1 %v2576_v49 }
0x21c9   :  { %v1935_v1 = vpop.permute.xlu1 %1934 }
0x21ca   :  { %v1937_v51 = vadd.f32 %v1935_v1, %v1927_v40 }
0x21cc   :  { %2741 = vtanh.f32 %v1937_v51 }
0x21cd   :  { %2743 = vtanh.f32 %v1235_v52  ;;  %v2096_v52 = vld [vmem:[#allocation8 + $0x2] ss:$4 sm:$0x3] }
0x21ce   :  { %2745 = vpow2.f32 %v2236_v43 }
0x21d6   :  { %v2742_v25 = vpop.eup %2741 }
0x21d7   :  { %1940 = vrot.lane.b32.xlu0 %v2742_v25, %s2861_s2  ;;  %v2744_v53 = vpop.eup %2743  ;;  %v2101_v25 = vrot.slane %v2096_v52, %v2973_v34 }
0x21d8   :  { %v2746_v54 = vpop.eup %2745 }
0x21d9   :  { %v2048_v55 = vadd.f32 1.0, %v2746_v54 }
0x21db   :  { %2054 = vrot.lane.b32.xlu0 %v2744_v53, %s2861_s2  ;;  %2747 = vrcp.f32 %v2048_v55 }
0x21e5   :  { %v2748_v32 = vpop.eup %2747 }
0x21e6   :  { %v2052_v57 = vmul.f32 0.0, %v2748_v32 }
0x2249   :  { %v1941_v33 = vpop.permute.xlu0 %1940 }
0x224a   :  { %v1943_v36 = vmul.f32 %v2740_v48, %v1941_v33 }
0x224c   :  { %1945 = vrot.lane.b32.xlu1 %v1943_v36, %s2864_s23 }
0x224d   :  { %v2055_v56 = vpop.permute.xlu0 %2054 }
0x224e   :  { %v2057_v46 = vmul.f32 %v2748_v32, %v2055_v56 }
0x2250   :  { %2059 = vrot.lane.b32.xlu0 %v2057_v46, %s2864_s23 }
0x22be   :  { %v1946_v8 = vpop.permute.xlu1 %1945 }
0x22bf   :  { %2364 = vmatmul.mubr.msk.f32.vlgmr.msra.gmra.mrb[22].mxu0 %vm1241_vm5, %v1946_v8 }
0x22c2   :  { %v2060_v35 = vpop.permute.xlu0 %2059 }
0x22c3   :  { %v2062_v9 = vadd.f32 %v2060_v35, %v2052_v57 }
0x22c5   :  { %2749 = vtanh.f32 %v2062_v9 }
0x22cf   :  { %v2750_v58 = vpop.eup %2749 }
0x22d0   :  { %2065 = vrot.lane.b32.xlu0 %v2750_v58, %s2861_s2 }
0x2342   :  { %v2066_v22 = vpop.permute.xlu0 %2065 }
0x2343   :  { %v2068_v37 = vmul.f32 %v2748_v32, %v2066_v22 }
0x2345   :  { %v2074_v48 = vrot.slane %v2068_v37, 6 }
0x2392   :  { %v2017_v19 = vpop.f32.mrb[22].mxu0 }
0x2393   :  { %v2018_v26 = vadd.f32 %v2017_v19, %v1947_v16  ;;  %v2365_v59 = vpop.f32.mrb[23].mxu0 }
0x2395   :  { %2751 = vtanh.f32 %v2018_v26  ;;  %v2235_v31 = vmul.f32 -1.442695, %v2018_v26 }
0x2397   :  { %2753 = vpow2.f32 %v2235_v31 }
0x239f   :  { %v2752_v28 = vpop.eup %2751 }
0x23a0   :  { %2030 = vrot.lane.b32.xlu1 %v2752_v28, %s2861_s2 }
0x23a1   :  { %v2754_v60 = vpop.eup %2753 }
0x23a2   :  { %v2024_v61 = vadd.f32 1.0, %v2754_v60 }
0x23a4   :  { %2755 = vrcp.f32 %v2024_v61 }
0x23ae   :  { %v2756_v62 = vpop.eup %2755 }
0x23af   :  { %v2028_v5 = vmul.f32 %v2756_v62, %v1937_v51 }
0x2412   :  { %v2031_v2 = vpop.permute.xlu1 %2030 }
0x2413   :  { %v2033_v3 = vmul.f32 %v2756_v62, %v2031_v2 }
0x2415   :  { %2035 = vrot.lane.b32.xlu1 %v2033_v3, %s2864_s23 }
0x2487   :  { %v2036_v6 = vpop.permute.xlu1 %2035 }
0x2488   :  { %v2038_v63 = vadd.f32 %v2036_v6, %v2028_v5 }
0x248a   :  { %2757 = vtanh.f32 %v2038_v63 }
0x2494   :  { %v2758_v44 = vpop.eup %2757 }
0x2495   :  { %2041 = vrot.lane.b32.xlu1 %v2758_v44, %s2861_s2 }
0x2499   :  { %2075 = vrot.lane.b32.xlu1 %v2074_v48, %s2861_s2 }
0x2507   :  { %v2042_v50 = vpop.permute.xlu1 %2041 }
0x2508   :  { %v2044_v0 = vmul.f32 %v2756_v62, %v2042_v50 }
0x250a   :  { %2070 = vrot.lane.b32.xlu0 %v2044_v0, %s2864_s23 }
0x250b   :  { %v2076_v40 = vpop.permute.xlu1 %2075 }
0x257c   :  { %v2071_v1 = vpop.permute.xlu0 %2070 }
0x257d   :  { %v2078_v51 = vsel %vm1241_vm5, %v2071_v1, %v2076_v40 }
0x257e   :  { %2237 = vmatmul.mubr.msk.f32.vlgmr.msra.gmra.mrb[16].mxu1 %vm172_vm3, %v2078_v51 }
0x2651   :  { %v2172_v53 = vpop.f32.mrb[16].mxu1 }
0x2652   :  { %v2173_v43 = vadd.f32 %v2172_v53, %v2101_v25  ;;  %v2174_v54 = vpop.f32.mrb[17].mxu1 }
0x2654   :  { %2177 = vst.msk [vmem:[#allocation9] sm:$0x3] %vm2176_vm6, %v2173_v43 }
0x2655   :  { %2836 = shalt.err (!%p2833_p0)
}
0x2656   :  { %s2837_s29 = scalar_lea.hbm %s3242_s3, 32 }
0x2657   :  { %p2838_p1 = scmp.ne.s32.totalorder %s3242_s3, %s2837_s29  ;;  %p2841_p2 = scmp.lt.u32.totalorder %s2837_s29, %s3242_s3 }
0x2659   :  { %p2843_p3 = pnand %p2841_p2, %p2838_p1 }
0x265b   :  { %2846 = shalt.err (!%p2843_p3)
}
0x265c   :  { %2187 = dma.vmem_to_hbm [thread:$0]  %s2185_s25, 32, %s3242_s3, [#allocation5]  }
0x265d   :  { %2851 = dma.done.wait [#allocation5], 32  }
0x265e   :  { %2852 = vsyncadd [#allocation5], 4294967264 }
0x265f   :  { %2191 = vsyncpa [#allocation4], 1 }
0x2660   :  { %2192 = vsyncpa [#allocation7], 1 }
0x2661   :  { %2193 = vsyncpa [#allocation5], 1 }

</bundles_post_ra>
